<compile_context>
chip_gen: v7x
topology: tpu7x:2x2x1
jax: 0.10.0
libtpu: 0.0.40
codegen_flags: <defaults>
</compile_context>

<pallas_src>
import functools

import jax
import jax.numpy as jnp
from jax.experimental import pallas as pl
from jax.experimental.pallas import tpu as pltpu

BOARD = 64              # 8x8 chess board -> the hardcoded 64 in the module
POLICY_OUT = 64 * 73    # 4672
N_PAD = 37 * 128        # 4736: policy dim padded to a multiple of 128 lanes
BN_EPS = 1e-5


def _round_up(x, m):
    return (x + m - 1) // m * m


def _policy_head_kernel(x_ref, wsel_ref, gamma_ref, beta_ref, wfc_ref, bfc_ref,
                        out_ref,
                        y_all_ref, sum_ref, ssq_ref, scale_ref, shift_ref,
                        *, bt, count):
    phase = pl.program_id(0)
    tile = pl.program_id(1)
    row0 = pl.multiple_of(tile * bt, bt)

    # -------- phase 0: 1x1 conv (MXU) + global BatchNorm batch statistics ----
    @pl.when(phase == 0)
    def _stats_pass():
        # One matmul whose output already has the FC operand layout:
        # column o*64+m == conv channel o, board square m (batch in sublanes).
        y = jnp.dot(x_ref[...], wsel_ref[...],
                    preferred_element_type=jnp.float32)             # (bt, 128)
        # Conv bias intentionally omitted: training-mode BN subtracts the
        # per-channel batch mean, which cancels a constant bias exactly.

        @pl.when(tile == 0)
        def _init():
            sum_ref[...] = jnp.zeros_like(sum_ref)
            ssq_ref[...] = jnp.zeros_like(ssq_ref)

        sum_ref[...] += jnp.sum(y, axis=0, keepdims=True)            # (1, 128)
        ssq_ref[...] += jnp.sum(y * y, axis=0, keepdims=True)        # (1, 128)

        # Cache conv output for the whole batch so phase 1 neither re-reads x
        # from HBM nor recomputes the conv.
        y_all_ref[pl.ds(row0, bt), :] = y

        # After the last tile all stats are in; fold them ONCE into per-column
        # (1,128) scale/shift vectors so phase 1 is a single vectorized affine
        # (no per-channel sub-lane slicing, no per-tile stat recompute).
        @pl.when(tile == pl.num_programs(1) - 1)
        def _finalize_stats():
            inv_n = 1.0 / float(count)
            m0 = jnp.sum(sum_ref[:, :BOARD], axis=1, keepdims=True) * inv_n
            m1 = jnp.sum(sum_ref[:, BOARD:], axis=1, keepdims=True) * inv_n
            e0 = jnp.sum(ssq_ref[:, :BOARD], axis=1, keepdims=True) * inv_n
            e1 = jnp.sum(ssq_ref[:, BOARD:], axis=1, keepdims=True) * inv_n
            col = jax.lax.broadcasted_iota(jnp.int32, (1, 2 * BOARD), 1)
            is_c0 = col < BOARD
            mean_vec = jnp.where(is_c0, m0, m1)                      # (1, 128)
            ex2_vec = jnp.where(is_c0, e0, e1)
            rstd_vec = jax.lax.rsqrt(ex2_vec - mean_vec * mean_vec + BN_EPS)
            scale_vec = gamma_ref[...] * rstd_vec
            scale_ref[...] = scale_vec
            shift_ref[...] = beta_ref[...] - mean_vec * scale_vec

    # -------- phase 1: normalize + ReLU + single fused FC matmul -------------
    @pl.when(phase == 1)
    def _fc_pass():
        y = y_all_ref[pl.ds(row0, bt), :]                            # (bt, 128)
        y_norm = jnp.maximum(y * scale_ref[...] + shift_ref[...], 0.0)
        out = jnp.dot(y_norm.astype(jnp.bfloat16), wfc_ref[...],
                      preferred_element_type=jnp.float32) + bfc_ref[...]
        out_ref[...] = out.astype(out_ref.dtype)


def prepare_params(params):
    """One-time parameter preprocessing (hoisted out of the per-call path)."""
    conv_w = jnp.asarray(params["conv_w"], jnp.float32)        # (2, C, 1, 1)
    C = conv_w.shape[1]
    wc = conv_w.reshape(2, C)

    # "Selection" conv weight (C*64, 128): row c*64+n, col o*64+m holds
    # wc[o, c] * (n == m), so x.reshape(B, C*64) @ wsel is the conv output in
    # exactly the layout the FC consumes (no in-kernel relayout).
    eye = jnp.eye(BOARD, dtype=jnp.float32)
    blocks = [(wc[o][:, None, None] * eye[None, :, :]).reshape(C * BOARD, BOARD)
              for o in range(2)]
    wsel = jnp.concatenate(blocks, axis=1)                     # (C*64, 128)

    # gamma/beta pre-broadcast to (1, 128) in the c*64+n column layout.
    gamma = jnp.repeat(jnp.asarray(params["bn_gamma"], jnp.float32),
                       BOARD).reshape(1, 2 * BOARD)
    beta = jnp.repeat(jnp.asarray(params["bn_beta"], jnp.float32),
                      BOARD).reshape(1, 2 * BOARD)

    # FC weight: transpose + pad N to 4736 + bf16 (one merged K=128 matmul).
    pad = ((0, 0), (0, N_PAD - POLICY_OUT))
    wfc = jnp.pad(jnp.asarray(params["fc_w"], jnp.float32).T,
                  pad).astype(jnp.bfloat16)                    # (128, 4736)
    bfc = jnp.pad(jnp.asarray(params["fc_b"], jnp.float32).reshape(1, POLICY_OUT),
                  pad)                                         # (1, 4736) f32

    # params["conv_b"] is unused: training-mode BN cancels the conv bias.
    return {"wsel": wsel, "gamma": gamma, "beta": beta,
            "wfc": wfc, "bfc": bfc, "channels": C}


def policy_head(x_nchw, prepared, *, block_batch=128):
    """x_nchw: (B, C, 8, 8) float32 -> (B, 4672) float32."""
    B, C, H, W = x_nchw.shape
    assert H * W == BOARD, "PolicyHead hardcodes an 8x8 board (64 squares)."
    assert C == prepared["channels"]

    # NCHW -> (B, C*64): pure reshape (k = c*64 + h*8 + w), no transpose.
    x_flat = x_nchw.reshape(B, C * BOARD).astype(jnp.float32)

    # Batch tiling: rows a multiple of 8; zero-pad rows contribute nothing to
    # the BN statistics because the conv has no bias.
    bt = _round_up(min(block_batch, _round_up(B, 8)), 8)
    b_pad = _round_up(B, bt)
    if b_pad != B:
        x_flat = jnp.pad(x_flat, ((0, b_pad - B), (0, 0)))
    nbt = b_pad // bt

    kernel = functools.partial(_policy_head_kernel, bt=bt, count=B * BOARD)

    # VMEM budget: resident weights + double-buffered x/out tiles + scratch.
    tile_bytes = bt * C * BOARD * 4 + bt * N_PAD * 4
    weight_bytes = (prepared["wsel"].size * 4 + prepared["wfc"].size * 2
                    + prepared["bfc"].size * 4
                    + prepared["gamma"].size * 4 + prepared["beta"].size * 4)
    scratch_bytes = b_pad * 128 * 4 + 4 * 128 * 4
    est = 2 * tile_bytes + weight_bytes + scratch_bytes
    vmem_limit = int(min(max(2 * est, 32 * 1024 * 1024), 64 * 1024 * 1024))

    cost = pl.CostEstimate(
        flops=2 * b_pad * (C * BOARD) * 128 + 2 * b_pad * 128 * N_PAD,
        transcendentals=2 * BOARD,
        bytes_accessed=int(x_flat.size * 4 + weight_bytes + b_pad * N_PAD * 4),
    )

    grid_spec = pltpu.PrefetchScalarGridSpec(
        num_scalar_prefetch=0,
        grid=(2, nbt),                                 # (phase, batch tile)
        in_specs=[
            # x: stream batch tiles in phase 0; in phase 1 pin the block index
            # to the last phase-0 tile so no redundant x DMA is issued.
            pl.BlockSpec((bt, C * BOARD),
                         lambda p, i: (i * (1 - p) + (nbt - 1) * p, 0)),
            pl.BlockSpec((C * BOARD, 128), lambda p, i: (0, 0)),   # wsel (resident)
            pl.BlockSpec((1, 2 * BOARD), lambda p, i: (0, 0)),     # gamma (1,128)
            pl.BlockSpec((1, 2 * BOARD), lambda p, i: (0, 0)),     # beta  (1,128)
            pl.BlockSpec((2 * BOARD, N_PAD), lambda p, i: (0, 0)), # wfc (resident)
            pl.BlockSpec((1, N_PAD), lambda p, i: (0, 0)),         # fc bias
        ],
        # Output block index stays 0 through phase 0 (nothing written), then
        # walks the batch tiles in phase 1 -> each tile written back once.
        out_specs=pl.BlockSpec((bt, N_PAD), lambda p, i: (i * p, 0)),
        scratch_shapes=[
            pltpu.VMEM((b_pad, 128), jnp.float32),   # cached conv output
            pltpu.VMEM((1, 128), jnp.float32),       # per-column sum
            pltpu.VMEM((1, 128), jnp.float32),       # per-column sum of squares
            pltpu.VMEM((1, 128), jnp.float32),       # fused BN scale vector
            pltpu.VMEM((1, 128), jnp.float32),       # fused BN shift vector
        ],
    )

    out = pl.pallas_call(
        kernel,
        grid_spec=grid_spec,
        out_shape=jax.ShapeDtypeStruct((b_pad, N_PAD), jnp.float32),
        compiler_params=pltpu.CompilerParams(
            # BN needs *global* batch statistics, so both axes are sequential.
            # TODO(synk): for v7x dual-TC, shard the 4736-wide FC/output over a
            # "parallel" grid axis instead (BN stats are per-channel only).
            dimension_semantics=("arbitrary", "arbitrary"),
            vmem_limit_bytes=vmem_limit,
        ),
        cost_estimate=cost,
    )(x_flat, prepared["wsel"], prepared["gamma"], prepared["beta"],
      prepared["wfc"], prepared["bfc"])

    return out[:B, :POLICY_OUT]


def policy_head_ref(x, params):
    """Pure-JAX reference mirroring the PyTorch forward (training-mode BN)."""
    B, C, H, W = x.shape
    wc = params["conv_w"].reshape(2, C)
    y = jnp.einsum('oc,bchw->bohw', wc, x) + params["conv_b"].reshape(1, 2, 1, 1)
    mean = jnp.mean(y, axis=(0, 2, 3), keepdims=True)
    var = jnp.mean((y - mean) ** 2, axis=(0, 2, 3), keepdims=True)
    y = (y - mean) / jnp.sqrt(var + BN_EPS)
    y = y * params["bn_gamma"].reshape(1, 2, 1, 1) + params["bn_beta"].reshape(1, 2, 1, 1)
    y = jnp.maximum(y, 0.0)
    yf = y.reshape(B, 2 * H * W)
    return yf @ params["fc_w"].T + params["fc_b"]


if __name__ == "__main__":
    # TODO(synk): running_mean / running_var updates of nn.BatchNorm2d (a
    # training-time side effect) are not materialized; the forward output does
    # not depend on them.
    B, C = 2, 4
    key = jax.random.PRNGKey(0)
    ks = jax.random.split(key, 7)
    params = {
        "conv_w":   0.10 * jax.random.normal(ks[0], (2, C, 1, 1), jnp.float32),
        "conv_b":   0.10 * jax.random.normal(ks[1], (2,), jnp.float32),
        "bn_gamma": 1.0 + 0.10 * jax.random.normal(ks[2], (2,), jnp.float32),
        "bn_beta":  0.10 * jax.random.normal(ks[3], (2,), jnp.float32),
        "fc_w":     0.05 * jax.random.normal(ks[4], (POLICY_OUT, 2 * BOARD), jnp.float32),
        "fc_b":     0.05 * jax.random.normal(ks[5], (POLICY_OUT,), jnp.float32),
    }
    x = jax.random.normal(ks[6], (B, C, 8, 8), jnp.float32)

    prepared = prepare_params(params)                 # one-time weight prep
    out = jax.block_until_ready(policy_head(x, prepared))
    ref = jax.block_until_ready(policy_head_ref(x, params))

    assert out.shape == (B, POLICY_OUT), out.shape
    err = float(jnp.max(jnp.abs(out - ref)))
    assert jnp.allclose(out, ref, rtol=5e-2, atol=5e-2), err
    print("KERNEL_OK")
</pallas_src>

<mosaic_0001>
module attributes {stable_mosaic.version = 11 : i64} {
  func.func @_policy_head_kernel(%arg0: i32, %arg1: i32, %arg2: memref<8x256xf32, #tpu.memory_space<vmem>>, %arg3: memref<256x128xf32, #tpu.memory_space<vmem>>, %arg4: memref<1x128xf32, #tpu.memory_space<vmem>>, %arg5: memref<1x128xf32, #tpu.memory_space<vmem>>, %arg6: memref<128x4736xbf16, #tpu.memory_space<vmem>>, %arg7: memref<1x4736xf32, #tpu.memory_space<vmem>>, %arg8: memref<8x4736xf32, #tpu.memory_space<vmem>>, %arg9: memref<8x128xf32, #tpu.memory_space<vmem>>, %arg10: memref<1x128xf32, #tpu.memory_space<vmem>>, %arg11: memref<1x128xf32, #tpu.memory_space<vmem>>, %arg12: memref<1x128xf32, #tpu.memory_space<vmem>>, %arg13: memref<1x128xf32, #tpu.memory_space<vmem>>) attributes {dimension_semantics = [#tpu.dimension_semantics<arbitrary>, #tpu.dimension_semantics<arbitrary>], iteration_bounds = array<i64: 2, 1>, scalar_prefetch = 0 : i64, scratch_operands = 5 : i64, tpu.core_type = #tpu.core_type<tc>, window_params = [{transform_indices = @transform_0, window_bounds = array<i64: 8, 256>}, {pipeline_mode = #tpu.pipeline_mode<synchronous>, transform_indices = @transform_1, window_bounds = array<i64: 256, 128>}, {pipeline_mode = #tpu.pipeline_mode<synchronous>, transform_indices = @transform_2, window_bounds = array<i64: 1, 128>}, {pipeline_mode = #tpu.pipeline_mode<synchronous>, transform_indices = @transform_3, window_bounds = array<i64: 1, 128>}, {pipeline_mode = #tpu.pipeline_mode<synchronous>, transform_indices = @transform_4, window_bounds = array<i64: 128, 4736>}, {pipeline_mode = #tpu.pipeline_mode<synchronous>, transform_indices = @transform_5, window_bounds = array<i64: 1, 4736>}, {transform_indices = @transform_6, window_bounds = array<i64: 8, 4736>}]} {
    %c8_i32 = arith.constant 8 : i32
    %0 = arith.muli %arg1, %c8_i32 : i32
    %1 = tpu.assume_multiple %0, 8 : i32
    %c0_i32 = arith.constant 0 : i32
    %2 = arith.cmpi eq, %arg0, %c0_i32 : i32
    %3 = arith.extui %2 : i1 to i32
    %c0_i32_0 = arith.constant 0 : i32
    %4 = arith.cmpi ne, %3, %c0_i32_0 : i32
    scf.if %4 {
      %c0 = arith.constant 0 : index
      %c0_2 = arith.constant 0 : index
      %8 = vector.load %arg2[%c0, %c0_2] : memref<8x256xf32, #tpu.memory_space<vmem>>, vector<8x256xf32>
      %c0_3 = arith.constant 0 : index
      %c0_4 = arith.constant 0 : index
      %9 = vector.load %arg3[%c0_3, %c0_4] : memref<256x128xf32, #tpu.memory_space<vmem>>, vector<256x128xf32>
      %cst = arith.constant dense<0.000000e+00> : vector<8x128xf32>
      %10 = tpu.matmul %8, %9, %cst {dimension_numbers = #tpu.dot_dimension_numbers<[1], [0], [0], [1], [0, 0, 1, 1], [], []>} : vector<8x256xf32>, vector<256x128xf32>, vector<8x128xf32> -> vector<8x128xf32>
      %c0_i32_5 = arith.constant 0 : i32
      %11 = arith.cmpi eq, %arg1, %c0_i32_5 : i32
      %12 = arith.extui %11 : i1 to i32
      %c0_i32_6 = arith.constant 0 : i32
      %13 = arith.cmpi ne, %12, %c0_i32_6 : i32
      scf.if %13 {
        %cst_20 = arith.constant 0.000000e+00 : f32
        %30 = vector.broadcast %cst_20 : f32 to vector<1x128xf32>
        %c0_21 = arith.constant 0 : index
        %c0_22 = arith.constant 0 : index
        %31 = vector.load %arg10[%c0_21, %c0_22] : memref<1x128xf32, #tpu.memory_space<vmem>>, vector<1x128xf32>
        tpu.vector_store %arg10[%c0_21, %c0_22], %30 {strides = array<i32>} : memref<1x128xf32, #tpu.memory_space<vmem>>, vector<1x128xf32>,
        %cst_23 = arith.constant 0.000000e+00 : f32
        %32 = vector.broadcast %cst_23 : f32 to vector<1x128xf32>
        %c0_24 = arith.constant 0 : index
        %c0_25 = arith.constant 0 : index
        %33 = vector.load %arg11[%c0_24, %c0_25] : memref<1x128xf32, #tpu.memory_space<vmem>>, vector<1x128xf32>
        tpu.vector_store %arg11[%c0_24, %c0_25], %32 {strides = array<i32>} : memref<1x128xf32, #tpu.memory_space<vmem>>, vector<1x128xf32>,
      } else {
      }
      %c0_7 = arith.constant 0 : index
      %c0_8 = arith.constant 0 : index
      %14 = vector.load %arg10[%c0_7, %c0_8] : memref<1x128xf32, #tpu.memory_space<vmem>>, vector<1x128xf32>
      %cst_9 = arith.constant dense<0.000000e+00> : vector<128xf32>
      %15 = vector.multi_reduction <add>, %10, %cst_9 [0] : vector<8x128xf32> to vector<128xf32>
      %16 = vector.shape_cast %15 : vector<128xf32> to vector<1x128xf32>
      %17 = arith.addf %14, %16 : vector<1x128xf32>
      %c0_10 = arith.constant 0 : index
      %c0_11 = arith.constant 0 : index
      %18 = vector.load %arg10[%c0_10, %c0_11] : memref<1x128xf32, #tpu.memory_space<vmem>>, vector<1x128xf32>
      tpu.vector_store %arg10[%c0_10, %c0_11], %17 {strides = array<i32>} : memref<1x128xf32, #tpu.memory_space<vmem>>, vector<1x128xf32>,
      %c0_12 = arith.constant 0 : index
      %c0_13 = arith.constant 0 : index
      %19 = vector.load %arg11[%c0_12, %c0_13] : memref<1x128xf32, #tpu.memory_space<vmem>>, vector<1x128xf32>
      %20 = arith.mulf %10, %10 : vector<8x128xf32>
      %cst_14 = arith.constant dense<0.000000e+00> : vector<128xf32>
      %21 = vector.multi_reduction <add>, %20, %cst_14 [0] : vector<8x128xf32> to vector<128xf32>
      %22 = vector.shape_cast %21 : vector<128xf32> to vector<1x128xf32>
      %23 = arith.addf %19, %22 : vector<1x128xf32>
      %c0_15 = arith.constant 0 : index
      %c0_16 = arith.constant 0 : index
      %24 = vector.load %arg11[%c0_15, %c0_16] : memref<1x128xf32, #tpu.memory_space<vmem>>, vector<1x128xf32>
      tpu.vector_store %arg11[%c0_15, %c0_16], %23 {strides = array<i32>} : memref<1x128xf32, #tpu.memory_space<vmem>>, vector<1x128xf32>,
      %25 = arith.index_cast %1 : i32 to index
      %c0_17 = arith.constant 0 : index
      %26 = vector.load %arg9[%25, %c0_17] : memref<8x128xf32, #tpu.memory_space<vmem>>, vector<8x128xf32>
      tpu.vector_store %arg9[%25, %c0_17], %10 {strides = array<i32>} : memref<8x128xf32, #tpu.memory_space<vmem>>, vector<8x128xf32>,
      %c0_i32_18 = arith.constant 0 : i32
      %27 = arith.cmpi eq, %arg1, %c0_i32_18 : i32
      %28 = arith.extui %27 : i1 to i32
      %c0_i32_19 = arith.constant 0 : i32
      %29 = arith.cmpi ne, %28, %c0_i32_19 : i32
      scf.if %29 {
        %c0_20 = arith.constant 0 : index
        %c0_21 = arith.constant 0 : index
        %30 = vector.load %arg10[%c0_20, %c0_21] : memref<1x128xf32, #tpu.memory_space<vmem>>, vector<1x64xf32>
        %cst_22 = arith.constant dense<0.000000e+00> : vector<1xf32>
        %31 = vector.multi_reduction <add>, %30, %cst_22 [1] : vector<1x64xf32> to vector<1xf32>
        %32 = vector.shape_cast %31 : vector<1xf32> to vector<1x1xf32>
        %cst_23 = arith.constant 7.812500e-03 : f32
        %33 = vector.broadcast %cst_23 : f32 to vector<1x1xf32>
        %34 = arith.mulf %32, %33 : vector<1x1xf32>
        %c0_24 = arith.constant 0 : index
        %c64 = arith.constant 64 : index
        %35 = vector.load %arg10[%c0_24, %c64] : memref<1x128xf32, #tpu.memory_space<vmem>>, vector<1x64xf32>
        %cst_25 = arith.constant dense<0.000000e+00> : vector<1xf32>
        %36 = vector.multi_reduction <add>, %35, %cst_25 [1] : vector<1x64xf32> to vector<1xf32>
        %37 = vector.shape_cast %36 : vector<1xf32> to vector<1x1xf32>
        %cst_26 = arith.constant 7.812500e-03 : f32
        %38 = vector.broadcast %cst_26 : f32 to vector<1x1xf32>
        %39 = arith.mulf %37, %38 : vector<1x1xf32>
        %c0_27 = arith.constant 0 : index
        %c0_28 = arith.constant 0 : index
        %40 = vector.load %arg11[%c0_27, %c0_28] : memref<1x128xf32, #tpu.memory_space<vmem>>, vector<1x64xf32>
        %cst_29 = arith.constant dense<0.000000e+00> : vector<1xf32>
        %41 = vector.multi_reduction <add>, %40, %cst_29 [1] : vector<1x64xf32> to vector<1xf32>
        %42 = vector.shape_cast %41 : vector<1xf32> to vector<1x1xf32>
        %cst_30 = arith.constant 7.812500e-03 : f32
        %43 = vector.broadcast %cst_30 : f32 to vector<1x1xf32>
        %44 = arith.mulf %42, %43 : vector<1x1xf32>
        %c0_31 = arith.constant 0 : index
        %c64_32 = arith.constant 64 : index
        %45 = vector.load %arg11[%c0_31, %c64_32] : memref<1x128xf32, #tpu.memory_space<vmem>>, vector<1x64xf32>
        %cst_33 = arith.constant dense<0.000000e+00> : vector<1xf32>
        %46 = vector.multi_reduction <add>, %45, %cst_33 [1] : vector<1x64xf32> to vector<1xf32>
        %47 = vector.shape_cast %46 : vector<1xf32> to vector<1x1xf32>
        %cst_34 = arith.constant 7.812500e-03 : f32
        %48 = vector.broadcast %cst_34 : f32 to vector<1x1xf32>
        %49 = arith.mulf %47, %48 : vector<1x1xf32>
        %50 = tpu.iota {dimensions = array<i32: 1>} : vector<1x128xi32>
        %c64_i32 = arith.constant 64 : i32
        %51 = vector.broadcast %c64_i32 : i32 to vector<1x128xi32>
        %52 = arith.cmpi slt, %50, %51 : vector<1x128xi32>
        %53 = vector.shape_cast %34 : vector<1x1xf32> to vector<1x1xf32>
        %54 = vector.broadcast %53 : vector<1x1xf32> to vector<1x128xf32>
        %55 = vector.shape_cast %39 : vector<1x1xf32> to vector<1x1xf32>
        %56 = vector.broadcast %55 : vector<1x1xf32> to vector<1x128xf32>
        %57 = arith.select %52, %54, %56 : vector<1x128xi1>, vector<1x128xf32>
        %58 = vector.shape_cast %44 : vector<1x1xf32> to vector<1x1xf32>
        %59 = vector.broadcast %58 : vector<1x1xf32> to vector<1x128xf32>
        %60 = vector.shape_cast %49 : vector<1x1xf32> to vector<1x1xf32>
        %61 = vector.broadcast %60 : vector<1x1xf32> to vector<1x128xf32>
        %62 = arith.select %52, %59, %61 : vector<1x128xi1>, vector<1x128xf32>
        %63 = arith.mulf %57, %57 : vector<1x128xf32>
        %64 = arith.subf %62, %63 : vector<1x128xf32>
        %cst_35 = arith.constant 9.99999974E-6 : f32
        %65 = vector.broadcast %cst_35 : f32 to vector<1x128xf32>
        %66 = arith.addf %64, %65 : vector<1x128xf32>
        %67 = math.rsqrt %66 : vector<1x128xf32>
        %c0_36 = arith.constant 0 : index
        %c0_37 = arith.constant 0 : index
        %68 = vector.load %arg4[%c0_36, %c0_37] : memref<1x128xf32, #tpu.memory_space<vmem>>, vector<1x128xf32>
        %69 = arith.mulf %68, %67 : vector<1x128xf32>
        %c0_38 = arith.constant 0 : index
        %c0_39 = arith.constant 0 : index
        %70 = vector.load %arg12[%c0_38, %c0_39] : memref<1x128xf32, #tpu.memory_space<vmem>>, vector<1x128xf32>
        tpu.vector_store %arg12[%c0_38, %c0_39], %69 {strides = array<i32>} : memref<1x128xf32, #tpu.memory_space<vmem>>, vector<1x128xf32>,
        %c0_40 = arith.constant 0 : index
        %c0_41 = arith.constant 0 : index
        %71 = vector.load %arg5[%c0_40, %c0_41] : memref<1x128xf32, #tpu.memory_space<vmem>>, vector<1x128xf32>
        %72 = arith.mulf %57, %69 : vector<1x128xf32>
        %73 = arith.subf %71, %72 : vector<1x128xf32>
        %c0_42 = arith.constant 0 : index
        %c0_43 = arith.constant 0 : index
        %74 = vector.load %arg13[%c0_42, %c0_43] : memref<1x128xf32, #tpu.memory_space<vmem>>, vector<1x128xf32>
        tpu.vector_store %arg13[%c0_42, %c0_43], %73 {strides = array<i32>} : memref<1x128xf32, #tpu.memory_space<vmem>>, vector<1x128xf32>,
      } else {
      }
    } else {
    }
    %c1_i32 = arith.constant 1 : i32
    %5 = arith.cmpi eq, %arg0, %c1_i32 : i32
    %6 = arith.extui %5 : i1 to i32
    %c0_i32_1 = arith.constant 0 : i32
    %7 = arith.cmpi ne, %6, %c0_i32_1 : i32
    scf.if %7 {
      %8 = arith.index_cast %1 : i32 to index
      %c0 = arith.constant 0 : index
      %9 = vector.load %arg9[%8, %c0] : memref<8x128xf32, #tpu.memory_space<vmem>>, vector<8x128xf32>
      %c0_2 = arith.constant 0 : index
      %c0_3 = arith.constant 0 : index
      %10 = vector.load %arg12[%c0_2, %c0_3] : memref<1x128xf32, #tpu.memory_space<vmem>>, vector<1x128xf32>
      %11 = vector.broadcast %10 : vector<1x128xf32> to vector<8x128xf32>
      %12 = arith.mulf %9, %11 : vector<8x128xf32>
      %c0_4 = arith.constant 0 : index
      %c0_5 = arith.constant 0 : index
      %13 = vector.load %arg13[%c0_4, %c0_5] : memref<1x128xf32, #tpu.memory_space<vmem>>, vector<1x128xf32>
      %14 = vector.broadcast %13 : vector<1x128xf32> to vector<8x128xf32>
      %15 = arith.addf %12, %14 : vector<8x128xf32>
      %cst = arith.constant 0.000000e+00 : f32
      %16 = vector.broadcast %cst : f32 to vector<8x128xf32>
      %17 = arith.maximumf %15, %16 : vector<8x128xf32>
      %18 = arith.truncf %17 : vector<8x128xf32> to vector<8x128xbf16>
      %c0_6 = arith.constant 0 : index
      %c0_7 = arith.constant 0 : index
      %19 = vector.load %arg6[%c0_6, %c0_7] : memref<128x4736xbf16, #tpu.memory_space<vmem>>, vector<128x4736xbf16>
      %cst_8 = arith.constant dense<0.000000e+00> : vector<8x4736xf32>
      %20 = tpu.matmul %18, %19, %cst_8 {dimension_numbers = #tpu.dot_dimension_numbers<[1], [0], [0], [1], [0, 0, 1, 1], [], []>} : vector<8x128xbf16>, vector<128x4736xbf16>, vector<8x4736xf32> -> vector<8x4736xf32>
      %c0_9 = arith.constant 0 : index
      %c0_10 = arith.constant 0 : index
      %21 = vector.load %arg7[%c0_9, %c0_10] : memref<1x4736xf32, #tpu.memory_space<vmem>>, vector<1x4736xf32>
      %22 = vector.broadcast %21 : vector<1x4736xf32> to vector<8x4736xf32>
      %23 = arith.addf %20, %22 : vector<8x4736xf32>
      %c0_11 = arith.constant 0 : index
      %c0_12 = arith.constant 0 : index
      %24 = vector.load %arg8[%c0_11, %c0_12] : memref<8x4736xf32, #tpu.memory_space<vmem>>, vector<8x4736xf32>
      tpu.vector_store %arg8[%c0_11, %c0_12], %23 {strides = array<i32>} : memref<8x4736xf32, #tpu.memory_space<vmem>>, vector<8x4736xf32>,
    } else {
    }
    return
  }
  func.func @transform_0(%arg0: i32, %arg1: i32) -> (i32, i32) {
    %c1_i32 = arith.constant 1 : i32
    %0 = arith.subi %c1_i32, %arg0 : i32
    %1 = arith.muli %arg1, %0 : i32
    %c0_i32 = arith.constant 0 : i32
    %2 = arith.muli %c0_i32, %arg0 : i32
    %3 = arith.addi %1, %2 : i32
    %c0_i32_0 = arith.constant 0 : i32
    %c0_i32_1 = arith.constant 0 : i32
    return %3, %c0_i32_0 : i32, i32
  }
  func.func @transform_1(%arg0: i32, %arg1: i32) -> (i32, i32) {
    %c0_i32 = arith.constant 0 : i32
    %c0_i32_0 = arith.constant 0 : i32
    %c0_i32_1 = arith.constant 0 : i32
    return %c0_i32, %c0_i32_0 : i32, i32
  }
  func.func @transform_2(%arg0: i32, %arg1: i32) -> (i32, i32) {
    %c0_i32 = arith.constant 0 : i32
    %c0_i32_0 = arith.constant 0 : i32
    %c0_i32_1 = arith.constant 0 : i32
    return %c0_i32, %c0_i32_0 : i32, i32
  }
  func.func @transform_3(%arg0: i32, %arg1: i32) -> (i32, i32) {
    %c0_i32 = arith.constant 0 : i32
    %c0_i32_0 = arith.constant 0 : i32
    %c0_i32_1 = arith.constant 0 : i32
    return %c0_i32, %c0_i32_0 : i32, i32
  }
  func.func @transform_4(%arg0: i32, %arg1: i32) -> (i32, i32) {
    %c0_i32 = arith.constant 0 : i32
    %c0_i32_0 = arith.constant 0 : i32
    %c0_i32_1 = arith.constant 0 : i32
    return %c0_i32, %c0_i32_0 : i32, i32
  }
  func.func @transform_5(%arg0: i32, %arg1: i32) -> (i32, i32) {
    %c0_i32 = arith.constant 0 : i32
    %c0_i32_0 = arith.constant 0 : i32
    %c0_i32_1 = arith.constant 0 : i32
    return %c0_i32, %c0_i32_0 : i32, i32
  }
  func.func @transform_6(%arg0: i32, %arg1: i32) -> (i32, i32) {
    %0 = arith.muli %arg1, %arg0 : i32
    %c0_i32 = arith.constant 0 : i32
    %c0_i32_0 = arith.constant 0 : i32
    return %0, %c0_i32 : i32, i32
  }
}

</mosaic_0001>

<bundles_post_ra>
// kernel: tpu_custom_call.1
= control target key start
LH: loop header
LB: loop body
LE: loop exit
PB: predicated region body
PF: predicated region fallthrough
CT: control target
= control target key end

     0   :  { %11 = vsyncpa [#allocation8], 0  ;;  %s5113_s0 = inlined_call_operand.hbm [shape: f32[8,256], index: 0, kind: input, shape index: {}]   ;;  %s5114_s1 = inlined_call_operand.hbm [shape: f32[256,128], index: 1, kind: input, shape index: {}]   ;;  %s5115_s2 = inlined_call_operand.hbm [shape: f32[1,128], index: 2, kind: input, shape index: {}]   ;;  %s5116_s3 = inlined_call_operand.hbm [shape: f32[1,128], index: 3, kind: input, shape index: {}]   ;;  %s5117_s4 = inlined_call_operand.hbm [shape: bf16[128,4736], index: 4, kind: input, shape index: {}]   ;;  %s5118_s5 = inlined_call_operand.hbm [shape: f32[1,4736], index: 5, kind: input, shape index: {}]   ;;  %s5119_s6 = inlined_call_operand.hbm [shape: f32[8,4736], index: 6, kind: output, shape index: {}]  }
   0x1   :  { %13 = vsyncpa [#allocation8 + $0x1], 0 }
   0x2   :  { %14 = vsyncpa [#allocation11], 0 }
   0x3   :  { %15 = vsyncpa [#allocation14], 0 }
   0x4   :  { %16 = vsyncpa [#allocation17], 0 }
   0x5   :  { %17 = vsyncpa [#allocation9], 0 }
   0x6   :  { %19 = vsyncpa [#allocation9 + $0x1], 0  ;;  %s4777_s21 = smov 0   ;;  %s4779_s22 = smov 0  }
   0x7   :  { %s4781_s23 = smov 0  }
   0x8 LB: > { %s3521_s24 = sadd.s32 4294967295, %s4724_s23   ;;  %s37_s26 = sadd.s32 1, %s4720_s22  ;;  %s4724_s23 = sphi %s4781_s23, %s25_s23   ;;  %s4720_s22 = sphi %s4779_s22, %s5136_s22   ;;  %s4716_s21 = sphi %s4777_s21, %s5135_s21  }
   0x9   : > { %p3523_p0 = scmp.ge.s32.totalorder %s4724_s23, 1  ;;  %p39_p1 = scmp.ge.s32.totalorder %s37_s26, 2 }
   0xa   : > { %p205_p2 = scmp.lt.s32.totalorder %s4724_s23, 3  ;;  %p4799_p3 = scmp.eq.s32.totalorder %s3521_s24, 0 }
   0xb   : > { %s5138_s26 = smov (%p39_p1, %s37_s26), 0  ;;  %s4726_s29 = smov [#allocation10]  }
   0xc   : > { %s5123_s27 = scalar_select %p4799_p3, 1, 0 }
   0xd   : > { %p4805_p4 = pnand %p3523_p0, %p205_p2  ;;  %s217_s30 = sshll.u32 %s4726_s29, 4  ;;  %s218_s30 = int_to_ptr.vmem [resolvable:$true] %s217_s30 }
   0xe   : > { %s4727_s8 = smov [#allocation13]   ;;  %s4488_s12 = scalar_lea.hbm %s5114_s1, 4096 }
   0xf   : > { %s5124_s28 = scalar_select %p4805_p4, 1, 0 }
  0x10   : > { %p3966_p5 = pneg %p4805_p4  ;;  %s242_s9 = sshll.u32 %s4727_s8, 4  ;;  %s243_s9 = int_to_ptr.vmem [resolvable:$true] %s242_s9 }
  0x11   : > { %p4489_p8 = scmp.ne.s32.totalorder %s5114_s1, %s4488_s12  ;;  %p4495_p12 = scmp.lt.u32.totalorder %s4488_s12, %s5114_s1 }
  0x12   : > { %p4814_p7 = pnand %p4799_p3, %p3966_p5 }
  0x14   : > { %p4826_p9 = pneg %p4814_p7 }
  0x16   : > { %p4491_p10 = pnand %p4826_p9, %p4489_p8 }
  0x18   : > { %p4492_p11 = pneg %p4491_p10 }
  0x1a   : > { %p4497_p13 = pnand %p4495_p12, %p4492_p11 }
  0x1c   : > { %4500 = shalt.err (!%p4497_p13)
}
  0x1d   : > { %s4501_s18 = scalar_lea.vmem %s218_s30, 4096  ;;  %p4509_p5 = scmp.lt.s32.totalorder %s218_s30, %s218_s30 }
  0x1e   : > { %p4502_p0 = scmp.ne.s32.totalorder %s218_s30, %s4501_s18  ;;  %p4510_p6 = scmp.lt.s32.totalorder %s4501_s18, %s4501_s18 }
  0x20   : > { %p4504_p1 = pnand %p4502_p0, %p4826_p9  ;;  %p4511_p3 = por %p4510_p6, %p4509_p5 }
  0x22   : > { %p4505_p2 = pneg %p4504_p1 }
  0x24   : > { %p4512_p4 = pnand %p4511_p3, %p4505_p2 }
  0x26   : > { %4515 = shalt.err (!%p4512_p4)
}
  0x27   : > { %s4728_s19 = smov 128   ;;  %s4729_s20 = smov 8  }
  0x28   : > { %3969 = dma.hbm_to_vmem [thread:$0]  (!%p4814_p7), %s5114_s1, 4096, %s218_s30, [#allocation11], %s4728_s19, %s4728_s19, %s4729_s20  }
  0x29   : > { %s4730_s10 = smov [#allocation12]   ;;  %s4516_s14 = scalar_lea.hbm %s5116_s3, 16 }
  0x2a   : > { %s231_s11 = sshll.u32 %s4730_s10, 4  ;;  %p4517_p3 = scmp.ne.s32.totalorder %s5116_s3, %s4516_s14  ;;  %s232_s11 = int_to_ptr.vmem [resolvable:$true] %s231_s11 }
  0x2b   : > { %p4523_p8 = scmp.lt.u32.totalorder %s4516_s14, %s5116_s3 }
  0x2c   : > { %p4519_p4 = pnand %p4517_p3, %p4826_p9 }
  0x2e   : > { %p4520_p6 = pneg %p4519_p4 }
  0x30   : > { %p4525_p10 = pnand %p4523_p8, %p4520_p6 }
  0x32   : > { %4528 = shalt.err (!%p4525_p10)
}
  0x33   : > { %s4529_s30 = scalar_lea.vmem %s243_s9, 16  ;;  %s4536_s19 = scalar_lea.vmem %s243_s9, 32 }
  0x34   : > { %p4530_p11 = scmp.ne.s32.totalorder %s243_s9, %s4529_s30  ;;  %p4537_p0 = scmp.lt.s32.totalorder %s243_s9, %s243_s9 }
  0x35   : > { %p4538_p1 = scmp.lt.s32.totalorder %s4536_s19, %s4529_s30 }
  0x36   : > { %p4532_p12 = pnand %p4530_p11, %p4826_p9 }
  0x37   : > { %p4539_p2 = por %p4538_p1, %p4537_p0 }
  0x38   : > { %p4533_p13 = pneg %p4532_p12 }
  0x3a   : > { %p4540_p5 = pnand %p4539_p2, %p4533_p13 }
  0x3c   : > { %4543 = shalt.err (!%p4540_p5)
}
  0x3d   : > { %3975 = dma.hbm_to_vmem [thread:$0]  (!%p4814_p7), %s5116_s3, 16, %s243_s9, [#allocation14]  }
  0x3e   : > { %s4544_s10 = scalar_lea.hbm %s5115_s2, 16 }
  0x3f   : > { %p4545_p3 = scmp.ne.s32.totalorder %s5115_s2, %s4544_s10  ;;  %p4551_p8 = scmp.lt.u32.totalorder %s4544_s10, %s5115_s2 }
  0x41   : > { %p4547_p4 = pnand %p4545_p3, %p4826_p9 }
  0x43   : > { %p4548_p6 = pneg %p4547_p4 }
  0x45   : > { %p4553_p10 = pnand %p4551_p8, %p4548_p6 }
  0x47   : > { %4556 = shalt.err (!%p4553_p10)
}
  0x48   : > { %s4557_s17 = scalar_lea.vmem %s232_s11, 16  ;;  %s4564_s9 = scalar_lea.vmem %s232_s11, 32 }
  0x49   : > { %p4558_p11 = scmp.ne.s32.totalorder %s232_s11, %s4557_s17  ;;  %p4565_p0 = scmp.lt.s32.totalorder %s232_s11, %s232_s11 }
  0x4a   : > { %p4566_p1 = scmp.lt.s32.totalorder %s4564_s9, %s4557_s17 }
  0x4b   : > { %p4560_p12 = pnand %p4558_p11, %p4826_p9 }
  0x4c   : > { %p4567_p2 = por %p4566_p1, %p4565_p0 }
  0x4d   : > { %p4561_p13 = pneg %p4560_p12 }
  0x4f   : > { %p4568_p5 = pnand %p4567_p2, %p4561_p13 }
  0x51   : > { %4571 = shalt.err (!%p4568_p5)
}
  0x52   : > { %3972 = dma.hbm_to_vmem [thread:$0]  (!%p4814_p7), %s5115_s2, 16, %s232_s11, [#allocation11]  }
  0x53   : > { %s4731_s19 = smov [#allocation15]   ;;  %s4572_s8 = scalar_lea.hbm %s5117_s4, 37888 }
  0x54   : > { %s252_s20 = sshll.u32 %s4731_s19, 4  ;;  %p4573_p3 = scmp.ne.s32.totalorder %s5117_s4, %s4572_s8  ;;  %s253_s20 = int_to_ptr.vmem [resolvable:$true] %s252_s20 }
  0x55   : > { %p4579_p8 = scmp.lt.u32.totalorder %s4572_s8, %s5117_s4 }
  0x56   : > { %p4575_p4 = pnand %p4573_p3, %p4826_p9 }
  0x58   : > { %p4576_p6 = pneg %p4575_p4 }
  0x5a   : > { %p4581_p10 = pnand %p4579_p8, %p4576_p6 }
  0x5c   : > { %4584 = shalt.err (!%p4581_p10)
}
  0x5d   : > { %s4585_s11 = scalar_lea.vmem %s253_s20, 37888  ;;  %p4593_p0 = scmp.lt.s32.totalorder %s253_s20, %s253_s20 }
  0x5e   : > { %p4586_p11 = scmp.ne.s32.totalorder %s253_s20, %s4585_s11  ;;  %p4594_p1 = scmp.lt.s32.totalorder %s4585_s11, %s4585_s11 }
  0x60   : > { %p4588_p12 = pnand %p4586_p11, %p4826_p9  ;;  %p4595_p2 = por %p4594_p1, %p4593_p0 }
  0x62   : > { %p4589_p13 = pneg %p4588_p12 }
  0x64   : > { %p4596_p5 = pnand %p4595_p2, %p4589_p13 }
  0x66   : > { %4599 = shalt.err (!%p4596_p5)
}
  0x67   : > { %s4732_s16 = smov 2368   ;;  %s4733_s17 = smov 148  }
  0x68   : > { %3978 = dma.hbm_to_vmem [thread:$0]  (!%p4814_p7), %s5117_s4, 37888, %s253_s20, [#allocation14], %s4732_s16, %s4732_s16, %s4733_s17  }
  0x69   : > { %s4734_s30 = smov [#allocation16]   ;;  %s4600_s8 = scalar_lea.hbm %s5118_s5, 592 }
  0x6a   : > { %s266_s19 = sshll.u32 %s4734_s30, 4  ;;  %p4601_p6 = scmp.ne.s32.totalorder %s5118_s5, %s4600_s8  ;;  %s267_s19 = int_to_ptr.vmem [resolvable:$true] %s266_s19 }
  0x6b   : > { %p4607_p11 = scmp.lt.u32.totalorder %s4600_s8, %s5118_s5 }
  0x6c   : > { %p4603_p8 = pnand %p4601_p6, %p4826_p9 }
  0x6e   : > { %p4604_p10 = pneg %p4603_p8 }
  0x70   : > { %p4609_p12 = pnand %p4607_p11, %p4604_p10 }
  0x72   : > { %4612 = shalt.err (!%p4609_p12)
}
  0x73   : > { %s4613_s20 = scalar_lea.vmem %s267_s19, 592  ;;  %s4620_s11 = scalar_lea.vmem %s267_s19, 608 }
  0x74   : > { %p4614_p13 = scmp.ne.s32.totalorder %s267_s19, %s4613_s20  ;;  %p4621_p2 = scmp.lt.s32.totalorder %s267_s19, %s267_s19 }
  0x75   : > { %p4622_p5 = scmp.lt.s32.totalorder %s4620_s11, %s4613_s20 }
  0x76   : > { %p4616_p0 = pnand %p4614_p13, %p4826_p9 }
  0x77   : > { %p4623_p4 = por %p4622_p5, %p4621_p2 }
  0x78   : > { %p4617_p1 = pneg %p4616_p0 }
  0x7a   : > { %p4624_p3 = pnand %p4623_p4, %p4617_p1 }
  0x7c   : > { %4627 = shalt.err (!%p4624_p3)
}
  0x7d   : > { %3981 = dma.hbm_to_vmem [thread:$0]  (!%p4814_p7), %s5118_s5, 592, %s267_s19, [#allocation17]  }
  0x7e   : > { %s4735_s9 = smov [#allocation7]   ;;  %p5127_p6 = scmp.lt.s32.totalorder %s4724_s23, 2 }
  0x7f   : > { %s291_s18 = sshll.u32 %s4735_s9, 4  ;;  %p5128_p8 = scmp.eq.s32.totalorder %s4724_s23, 0  ;;  %s292_s18 = int_to_ptr.vmem [resolvable:$true] %s291_s18 }
  0x80   : > { %s4628_s7 = scalar_lea.hbm %s5113_s0, 256 }
  0x81   : > { %p4920_p9 = pnand %p5128_p8, %p5127_p6  ;;  %p4629_p3 = scmp.ne.s32.totalorder %s5113_s0, %s4628_s7 }
  0x82   : > { %p4635_p11 = scmp.lt.u32.totalorder %s4628_s7, %s5113_s0 }
  0x83   : > { %p4630_p7 = pneg %p4920_p9 }
  0x85   : > { %p4631_p4 = pnand %p4630_p7, %p4629_p3 }
  0x87   : > { %p4632_p10 = pneg %p4631_p4 }
  0x89   : > { %p4637_p12 = pnand %p4635_p11, %p4632_p10 }
  0x8b   : > { %4640 = shalt.err (!%p4637_p12)
}
  0x8c   : > { %s4641_s12 = scalar_lea.vmem %s292_s18, 256  ;;  %s4648_s13 = scalar_lea.vmem %s292_s18, 512 }
  0x8d   : > { %p4642_p13 = scmp.ne.s32.totalorder %s292_s18, %s4641_s12  ;;  %p4649_p2 = scmp.lt.s32.totalorder %s292_s18, %s292_s18 }
  0x8e   : > { %p4650_p5 = scmp.lt.s32.totalorder %s4648_s13, %s4641_s12 }
  0x8f   : > { %p4644_p0 = pnand %p4642_p13, %p4630_p7 }
  0x90   : > { %p4651_p6 = por %p4650_p5, %p4649_p2 }
  0x91   : > { %p4645_p1 = pneg %p4644_p0 }
  0x93   : > { %p4652_p8 = pnand %p4651_p6, %p4645_p1 }
  0x95   : > { %4655 = shalt.err (!%p4652_p8)
}
  0x96   : > { %3985 = dma.hbm_to_vmem [thread:$0]  (!%p4920_p9), %s5113_s0, 256, %s292_s18, [#allocation8]  }
  0x97   : > { %p5130_p3 = scmp.ne.s32.totalorder %s5124_s28, 0 }
  0x98   : > { %p5131_p4 = scmp.ne.s32.totalorder (!%p5130_p3), %s5123_s27, 0 }
  0x99   : > { %300 = sbr.rel (%p5130_p3) target bundleno = 1290 (0x50a), region = 44 }
  0xa0   : > { %4695 = dma.done.wait (%p5131_p4), [#allocation8], 256  }
  0xa1   : > { %4697 = vsyncadd (%p5131_p4), [#allocation8], 4294967040 }
  0xa2   : > { %4699 = dma.done.wait (%p5131_p4), [#allocation11], 4112  }
  0xa3   : > { %4701 = vsyncadd (%p5131_p4), [#allocation11], 4294963184 }
  0xa4   : > { %4703 = dma.done.wait (%p5131_p4), [#allocation14], 37904  }
  0xa5   : > { %4705 = vsyncadd (%p5131_p4), [#allocation14], 4294929392 }
  0xa6   : > { %4707 = dma.done.wait (%p5131_p4), [#allocation17], 592  }
  0xa7   : > { %4709 = vsyncadd (%p5131_p4), [#allocation17], 4294966704  ;;  %p3538_p9 = scmp.ne.s32.totalorder %s4716_s21, 0 }
  0xa8   : > { %v382_v0 = vld [vmem:[#allocation10 + $0x80] sm:$0xff] (!%p3538_p9)  ;;  %v383_v1 = vld [vmem:[#allocation10 + $0x88] sm:$0xff] (!%p3538_p9)  ;;  %v384_v5 = vld [vmem:[#allocation10 + $0x90] sm:$0xff] (!%p3538_p9)  ;;  %v4736_v50 = vmov (!%p3538_p9), 0.0   ;;  %vm499_vm0 = vcmask (!%p3538_p9), 516096   ;;  %s4737_s27 = smov (!%p3538_p9), 64  }
  0xa9   : > { %363 = sbr.rel (%p3538_p9) target bundleno = 729 (0x2d9), region = 72  ;;  %v366_v2 = vld [vmem:[#allocation10] sm:$0xff] (!%p3538_p9)  ;;  %v3906_v3 = vpack.c.bf16 (!%p3538_p9), %v383_v1, %v382_v0  ;;  %v367_v4 = vld [vmem:[#allocation10 + $0x8] sm:$0xff] (!%p3538_p9)  ;;  %v385_v6 = vld [vmem:[#allocation10 + $0x98] sm:$0xff] (!%p3538_p9)  ;;  %472 = vst [vmem:[#allocation3] sm:$0x1] (!%p3538_p9), %v4736_v50 }
  0xaa   : > { %v3908_v7 = vpack.c.bf16 (!%p3538_p9), %v367_v4, %v366_v2  ;;  %v3910_v8 = vpack.c.bf16 (!%p3538_p9), %v385_v6, %v384_v5  ;;  %v368_v9 = vld [vmem:[#allocation10 + $0x10] sm:$0xff] (!%p3538_p9)  ;;  %v369_v10 = vld [vmem:[#allocation10 + $0x18] sm:$0xff] (!%p3538_p9)  ;;  %v386_v11 = vld [vmem:[#allocation10 + $0xa0] sm:$0xff] (!%p3538_p9)  ;;  %473 = vst [vmem:[#allocation4] sm:$0x1] (!%p3538_p9), %v4736_v50 }
  0xab   : > { %3907 = vmatprep.subr.bf16.mxu0 (!%p3538_p9), %v3906_v3  ;;  %v387_v12 = vld [vmem:[#allocation10 + $0xa8] sm:$0xff] (!%p3538_p9)  ;;  %v3912_v13 = vpack.c.bf16 (!%p3538_p9), %v369_v10, %v368_v9  ;;  %v370_v15 = vld [vmem:[#allocation10 + $0x20] sm:$0xff] (!%p3538_p9)  ;;  %v388_v17 = vld [vmem:[#allocation10 + $0xb0] sm:$0xff] (!%p3538_p9)  ;;  %v505_v3 = vlaneseq (!%p3538_p9) }
  0xac   : > { %3909 = vmatpush3.bf16.msra.mxu0 (!%p3538_p9), %v3908_v7  ;;  %v3914_v14 = vpack.c.bf16 (!%p3538_p9), %v387_v12, %v386_v11  ;;  %v371_v16 = vld [vmem:[#allocation10 + $0x28] sm:$0xff] (!%p3538_p9)  ;;  %v389_v18 = vld [vmem:[#allocation10 + $0xb8] sm:$0xff] (!%p3538_p9)  ;;  %v372_v21 = vld [vmem:[#allocation10 + $0x30] sm:$0xff] (!%p3538_p9) }
  0xad   : > { %3911 = vmatprep.subr.bf16.mxu0 (!%p3538_p9), %v3910_v8  ;;  %v3916_v19 = vpack.c.bf16 (!%p3538_p9), %v371_v16, %v370_v15  ;;  %v3918_v20 = vpack.c.bf16 (!%p3538_p9), %v389_v18, %v388_v17  ;;  %v373_v22 = vld [vmem:[#allocation10 + $0x38] sm:$0xff] (!%p3538_p9)  ;;  %v390_v23 = vld [vmem:[#allocation10 + $0xc0] sm:$0xff] (!%p3538_p9)  ;;  %v391_v24 = vld [vmem:[#allocation10 + $0xc8] sm:$0xff] (!%p3538_p9)  ;;  %v506_v8 = vshrl.u32 (!%p3538_p9), %v505_v3, 7 }
  0xae   : > { %v365_v25 = vld [vmem:[#allocation7 + $0x8] sm:$0xff] (!%p3538_p9)  ;;  %v3920_v26 = vpack.c.bf16 (!%p3538_p9), %v373_v22, %v372_v21  ;;  %v3922_v27 = vpack.c.bf16 (!%p3538_p9), %v391_v24, %v390_v23  ;;  %v374_v28 = vld [vmem:[#allocation10 + $0x40] sm:$0xff] (!%p3538_p9)  ;;  %v392_v30 = vld [vmem:[#allocation10 + $0xd0] sm:$0xff] (!%p3538_p9)  ;;  %v534_v21 = vand.u32 (!%p3538_p9), 127, %v505_v3 }
  0xaf   : > { %462 = vmatprep.mubr.f32.mxu0 (!%p3538_p9), %v365_v25  ;;  %v375_v29 = vld [vmem:[#allocation10 + $0x48] sm:$0xff] (!%p3538_p9)  ;;  %v393_v31 = vld [vmem:[#allocation10 + $0xd8] sm:$0xff] (!%p3538_p9)  ;;  %v376_v34 = vld [vmem:[#allocation10 + $0x50] sm:$0xff] (!%p3538_p9)  ;;  %v507_v9 = vsub.s32 (!%p3538_p9), 0, %v506_v8 }
  0xb0   : > { %3913 = vmatpush3.bf16.msra.mxu0 %v3912_v13  ;;  %v3924_v32 = vpack.c.bf16 %v375_v29, %v374_v28  ;;  %v3926_v33 = vpack.c.bf16 %v393_v31, %v392_v30  ;;  %v377_v35 = vld [vmem:[#allocation10 + $0x58] sm:$0xff]  ;;  %v394_v36 = vld [vmem:[#allocation10 + $0xe0] sm:$0xff]  ;;  %v395_v37 = vld [vmem:[#allocation10 + $0xe8] sm:$0xff]  ;;  %vm535_vm1 = vcmp.lt.s32.totalorder %v534_v21, 64 }
  0xb1   : > { %3915 = vmatprep.subr.bf16.mxu0 %v3914_v14  ;;  %v3928_v38 = vpack.c.bf16 %v377_v35, %v376_v34  ;;  %v3930_v39 = vpack.c.bf16 %v395_v37, %v394_v36  ;;  %v378_v40 = vld [vmem:[#allocation10 + $0x60] sm:$0xff]  ;;  %v379_v41 = vld [vmem:[#allocation10 + $0x68] sm:$0xff]  ;;  %v396_v42 = vld [vmem:[#allocation10 + $0xf0] sm:$0xff] }
  0xb2   : > { %v397_v43 = vld [vmem:[#allocation10 + $0xf8] sm:$0xff]  ;;  %v3932_v44 = vpack.c.bf16 %v379_v41, %v378_v40  ;;  %v380_v46 = vld [vmem:[#allocation10 + $0x70] sm:$0xff]  ;;  %v364_v49 = vld [vmem:[#allocation7] sm:$0xff] }
  0xb3   : > { %v3934_v45 = vpack.c.bf16 %v397_v43, %v396_v42  ;;  %v381_v47 = vld [vmem:[#allocation10 + $0x78] sm:$0xff]  ;;  %v542_v34 = vld [vmem:[#allocation12] sm:$0x1]  ;;  %v545_v37 = vld [vmem:[#allocation13] sm:$0x1] }
  0xb4   : > { %3917 = vmatpush3.bf16.msra.mxu0 %v3916_v19  ;;  %v3936_v48 = vpack.c.bf16 %v381_v47, %v380_v46  ;;  %v474_v0 = vld [vmem:[#allocation3] sm:$0x1]  ;;  %v483_v4 = vld [vmem:[#allocation4] sm:$0x1] }
  0xb5   : > { %3919 = vmatprep.subr.bf16.mxu0 %v3918_v20 }
  0xb8   : > { %3921 = vmatpush3.bf16.msra.mxu0 %v3920_v26 }
  0xb9   : > { %3923 = vmatprep.subr.bf16.mxu0 %v3922_v27 }
  0xbc   : > { %3925 = vmatpush3.bf16.msra.mxu0 %v3924_v32 }
  0xbd   : > { %3927 = vmatprep.subr.bf16.mxu0 %v3926_v33 }
  0xc0   : > { %3929 = vmatpush3.bf16.msra.mxu0 %v3928_v38 }
  0xc1   : > { %3931 = vmatprep.subr.bf16.mxu0 %v3930_v39 }
  0xc4   : > { %3933 = vmatpush3.bf16.msra.mxu0 %v3932_v44 }
  0xc5   : > { %3935 = vmatprep.subr.bf16.mxu0 %v3934_v45 }
  0xc8   : > { %3937 = vmatpush3.bf16.msra.mxu0 %v3936_v48 }
  0xcb   : > { %463 = vmatmul.mubr.f32.vlgmr.msra.gmra.mrb[0].mxu0 %v364_v49 }
 0x19e   : > { %v3874_v51 = vpop.f32.mrb[0].mxu0 }
 0x19f   : > { %v3875_v52 = vpop.f32.mrb[1].mxu0 }
 0x1a0   : > { %v3876_v53 = vadd.f32 %v3875_v52, %v3874_v51 }
 0x1a2   : > { %v475_v54 = vrot.slane %v3876_v53, 4  ;;  %v484_v55 = vmul.f32 %v3876_v53, %v3876_v53  ;;  %494 = vst [vmem:[#allocation2] sm:$0xff] %v3876_v53 }
 0x1a4   : > { %v476_v56 = vadd.f32 %v3876_v53, %v475_v54  ;;  %v485_v57 = vrot.slane %v484_v55, 4 }
 0x1a6   : > { %v477_v58 = vrot.slane %v476_v56, 2  ;;  %v486_v59 = vadd.f32 %v485_v57, %v484_v55 }
 0x1a8   : > { %v478_v60 = vadd.f32 %v477_v58, %v476_v56  ;;  %v487_v61 = vrot.slane %v486_v59, 2 }
 0x1aa   : > { %v479_v62 = vrot.slane %v478_v60, 1  ;;  %v488_v63 = vadd.f32 %v487_v61, %v486_v59 }
 0x1ac   : > { %v480_v1 = vadd.f32 %v479_v62, %v478_v60  ;;  %v489_v2 = vrot.slane %v488_v63, 1 }
 0x1ae   : > { %v481_v5 = vadd.f32 %v480_v1, %v474_v0  ;;  %v490_v6 = vadd.f32 %v489_v2, %v488_v63 }
 0x1b0   : > { %482 = vst [vmem:[#allocation3] sm:$0x1] %v481_v5  ;;  %v491_v7 = vadd.f32 %v490_v6, %v483_v4 }
 0x1b2   : > { %492 = vst [vmem:[#allocation4] sm:$0x1] %v491_v7 }
 0x1b7   : > { %v498_v10 = vld [vmem:[#allocation3] sm:$0x1] }
 0x1b8   : > { %v500_v11 = vsel %vm499_vm0, %v498_v10, 0.0  ;;  %v508_v12 = vrot.slane %v498_v10, %v507_v9 }
 0x1b9   : > { %501 = vadd.xlane.f32.xlu1 %v500_v11  ;;  %v516_v13 = vld [vmem:[#allocation4] sm:$0x1] }
 0x1ba   : > { %509 = vrot.lane.b32.xlu0 %v508_v12, %s4737_s27  ;;  %v525_v14 = vrot.slane %v516_v13, %v507_v9  ;;  %v517_v15 = vsel %vm499_vm0, %v516_v13, 0.0 }
 0x1be   : > { %526 = vrot.lane.b32.xlu0 %v525_v14, %s4737_s27 }
 0x1dd   : > { %518 = vadd.xlane.f32.xlu0 %v517_v15 }
 0x22c   : > { %v510_v16 = vpop.permute.xlu0 %509 }
 0x22d   : > { %v512_v17 = vsel %vm499_vm0, %v510_v16, 0.0 }
 0x22e   : > { %513 = vadd.xlane.f32.xlu1 %v512_v17 }
 0x230   : > { %v527_v18 = vpop.permute.xlu0 %526 }
 0x231   : > { %v529_v19 = vsel %vm499_vm0, %v527_v18, 0.0 }
 0x232   : > { %530 = vadd.xlane.f32.xlu1 %v529_v19 }
 0x246   : > { %v502_v20 = vpop.xlane.xlu1 %501 }
 0x247   : > { %v503_v23 = vmul.f32 0.0078125, %v502_v20 }
 0x26a   : > { %v519_v25 = vpop.xlane.xlu0 %518 }
 0x26b   : > { %v520_v28 = vmul.f32 0.0078125, %v519_v25 }
 0x2bb   : > { %v514_v22 = vpop.xlane.xlu1 %513 }
 0x2bc   : > { %v515_v24 = vmul.f32 0.0078125, %v514_v22 }
 0x2be   : > { %v536_v26 = vsel %vm535_vm1, %v503_v23, %v515_v24 }
 0x2bf   : > { %v531_v27 = vpop.xlane.xlu1 %530  ;;  %v538_v30 = vmul.f32 %v536_v26, %v536_v26 }
 0x2c0   : > { %v532_v29 = vmul.f32 0.0078125, %v531_v27 }
 0x2c2   : > { %v537_v31 = vsel %vm535_vm1, %v520_v28, %v532_v29 }
 0x2c3   : > { %v539_v32 = vsub.f32 %v537_v31, %v538_v30 }
 0x2c5   : > { %v540_v33 = vadd.f32 1e-05, %v539_v32 }
 0x2c7   : > { %4046 = vrsqrt.f32 %v540_v33 }
 0x2d1   : > { %v4047_v35 = vpop.eup %4046 }
 0x2d2   : > { %v543_v36 = vmul.f32 %v4047_v35, %v542_v34 }
 0x2d4   : > { %544 = vst [vmem:[#allocation5] sm:$0x1] %v543_v36  ;;  %v546_v38 = vmul.f32 %v543_v36, %v536_v26 }
 0x2d6   : > { %v547_v39 = vsub.f32 %v545_v37, %v546_v38 }
 0x2d8   : > { %548 = vst [vmem:[#allocation6] sm:$0x1] %v547_v39 }
 0x2d9 PF: > { %p3539_p7 = scmp.ne.s32.totalorder %s4716_s21, 1 }
 0x2da   : > { %v4048_v40 = vld [vmem:[#allocation15 + $0x4] ss:$148 sps:$4 sm:$0xff] (!%p3539_p7)   ;;  %v4050_v41 = vld [vmem:[#allocation15] ss:$148 sps:$4 sm:$0xff] (!%p3539_p7)   ;;  %v4738_v42 = vmov (!%p3539_p7), 0   ;;  %vm4740_vm2 = vmmov (!%p3539_p7), 0  }
 0x2db   : > { %552 = sbr.rel (%p3539_p7) target bundleno = 1267 (0x4f3), region = 84  ;;  %2592 = vmatprep.mubr.bf16.mxu0 (!%p3539_p7), %v4738_v42  ;;  %2633 = vmatprep.mubr.bf16.mxu1 (!%p3539_p7), %v4738_v42  ;;  %v4051_v43 = vld [vmem:[#allocation15 + $0x12c] ss:$148 sps:$4 sm:$0xff] (!%p3539_p7)   ;;  %v4053_v44 = vld [vmem:[#allocation15 + $0x128] ss:$148 sps:$4 sm:$0xff] (!%p3539_p7)   ;;  %v554_v55 = vld [vmem:[#allocation2] sm:$0xff] (!%p3539_p7) }
 0x2dc   : > { %2560 = vmatprep.subr.bf16.mxu0 (!%p3539_p7), %v4048_v40  ;;  %v4054_v45 = vld [vmem:[#allocation15 + $0x254] ss:$148 sps:$4 sm:$0xff] (!%p3539_p7)   ;;  %v4056_v46 = vld [vmem:[#allocation15 + $0x250] ss:$148 sps:$4 sm:$0xff] (!%p3539_p7)   ;;  %v4059_v48 = vld [vmem:[#allocation15 + $0x378] ss:$148 sps:$4 sm:$0xff] (!%p3539_p7)  }
 0x2dd   : > { %2561 = vmatpush1.bf16.msra.mxu0 (!%p3539_p7), %v4050_v41  ;;  %v4057_v47 = vld [vmem:[#allocation15 + $0x37c] ss:$148 sps:$4 sm:$0xff] (!%p3539_p7)   ;;  %v4071_v49 = vld [vmem:[#allocation15 + $0xc] ss:$148 sps:$4 sm:$0xff] (!%p3539_p7)   ;;  %v4060_v51 = vld [vmem:[#allocation15 + $0x4a4] ss:$148 sps:$4 sm:$0xff] (!%p3539_p7)  }
 0x2de   : > { %2562 = vmatprep.subr.bf16.mxu0 (!%p3539_p7), %v4051_v43  ;;  %v4074_v50 = vld [vmem:[#allocation15 + $0x8] ss:$148 sps:$4 sm:$0xff] (!%p3539_p7)   ;;  %v4062_v52 = vld [vmem:[#allocation15 + $0x4a0] ss:$148 sps:$4 sm:$0xff] (!%p3539_p7)   ;;  %2601 = vmatprep.subr.bf16.mxu1 (!%p3539_p7), %v4071_v49  ;;  %v3540_v56 = vld [vmem:[#allocation5] ss:$0 sm:$0xff] (!%p3539_p7) }
 0x2df   : > { %v4075_v53 = vld [vmem:[#allocation15 + $0x134] ss:$148 sps:$4 sm:$0xff] (!%p3539_p7)   ;;  %v4063_v54 = vld [vmem:[#allocation15 + $0x5cc] ss:$148 sps:$4 sm:$0xff] (!%p3539_p7)   ;;  %2602 = vmatpush1.bf16.msra.mxu1 (!%p3539_p7), %v4074_v50  ;;  %v4080_v57 = vld [vmem:[#allocation15 + $0x130] ss:$148 sps:$4 sm:$0xff] (!%p3539_p7)   ;;  %v562_v61 = vmul.f32 (!%p3539_p7), %v3540_v56, %v554_v55 }
 0x2e0   : > { %2603 = vmatprep.subr.bf16.mxu1 (!%p3539_p7), %v4075_v53  ;;  %v4081_v58 = vld [vmem:[#allocation15 + $0x25c] ss:$148 sps:$4 sm:$0xff] (!%p3539_p7)   ;;  %v3541_v60 = vld [vmem:[#allocation6] ss:$0 sm:$0xff] (!%p3539_p7)  ;;  %v4066_v0 = vld [vmem:[#allocation15 + $0x6f4] ss:$148 sps:$4 sm:$0xff] (!%p3539_p7)  }
 0x2e1   : > { %2563 = vmatpush1.bf16.msra.mxu0 (!%p3539_p7), %v4053_v44  ;;  %v4065_v59 = vld [vmem:[#allocation15 + $0x5c8] ss:$148 sps:$4 sm:$0xff] (!%p3539_p7)   ;;  %v4086_v62 = vld [vmem:[#allocation15 + $0x258] ss:$148 sps:$4 sm:$0xff] (!%p3539_p7)   ;;  %v570_v1 = vadd.f32 (!%p3539_p7), %v3541_v60, %v562_v61  ;;  %v4092_v2 = vld [vmem:[#allocation15 + $0x380] ss:$148 sps:$4 sm:$0xff] (!%p3539_p7)  }
 0x2e2   : > { %2564 = vmatprep.subr.bf16.mxu0 %v4054_v45  ;;  %v4087_v63 = vld [vmem:[#allocation15 + $0x384] ss:$148 sps:$4 sm:$0xff]   ;;  %v4093_v4 = vld [vmem:[#allocation15 + $0x4ac] ss:$148 sps:$4 sm:$0xff]   ;;  %v4069_v5 = vld [vmem:[#allocation15 + $0x81c] ss:$148 sps:$4 sm:$0xff]  }
 0x2e3   : > { %2604 = vmatpush1.bf16.msra.mxu1 %v4080_v57  ;;  %v4068_v3 = vld [vmem:[#allocation15 + $0x6f0] ss:$148 sps:$4 sm:$0xff]   ;;  %v4073_v6 = vld [vmem:[#allocation15 + $0x818] ss:$148 sps:$4 sm:$0xff]   ;;  %v571_v7 = vmax.f32 %v570_v1, 0.0 }
 0x2e4   : > { %2605 = vmatprep.subr.bf16.mxu1 %v4081_v58  ;;  %v4098_v8 = vld [vmem:[#allocation15 + $0x4a8] ss:$148 sps:$4 sm:$0xff]   ;;  %v4104_v12 = vld [vmem:[#allocation15 + $0x5d0] ss:$148 sps:$4 sm:$0xff]   ;;  %v4110_v16 = vld [vmem:[#allocation15 + $0x6f8] ss:$148 sps:$4 sm:$0xff]  }
 0x2e5   : > { %2565 = vmatpush1.bf16.msra.mxu0 %v4056_v46  ;;  %v4099_v9 = vld [vmem:[#allocation15 + $0x5d4] ss:$148 sps:$4 sm:$0xff]   ;;  %v4966_v11 = vpack.c.bf16 %v571_v7, %v571_v7  ;;  %v4077_v13 = vld [vmem:[#allocation15 + $0x10] ss:$148 sps:$4 sm:$0xff]   ;;  %v4083_v17 = vld [vmem:[#allocation15 + $0x138] ss:$148 sps:$4 sm:$0xff]  }
 0x2e6   : > { %2566 = vmatprep.subr.bf16.mxu0 %v4057_v47  ;;  %v4079_v10 = vld [vmem:[#allocation15 + $0x14] ss:$148 sps:$4 sm:$0xff]   ;;  %v4105_v14 = vld [vmem:[#allocation15 + $0x6fc] ss:$148 sps:$4 sm:$0xff]   ;;  %v4111_v18 = vld [vmem:[#allocation15 + $0x824] ss:$148 sps:$4 sm:$0xff]  }
 0x2e7   : > { %2606 = vmatpush1.bf16.msra.mxu1 %v4086_v62  ;;  %v4085_v15 = vld [vmem:[#allocation15 + $0x13c] ss:$148 sps:$4 sm:$0xff]   ;;  %v4091_v19 = vld [vmem:[#allocation15 + $0x264] ss:$148 sps:$4 sm:$0xff]   ;;  %v4116_v20 = vld [vmem:[#allocation15 + $0x820] ss:$148 sps:$4 sm:$0xff]  }
 0x2e8   : > { %2607 = vmatprep.subr.bf16.mxu1 %v4087_v63  ;;  %v4089_v21 = vld [vmem:[#allocation15 + $0x260] ss:$148 sps:$4 sm:$0xff]   ;;  %v4122_v22 = vld [vmem:[#allocation15 + $0x1c] ss:$148 sps:$4 sm:$0xff]   ;;  %v4120_v24 = vld [vmem:[#allocation15 + $0x18] ss:$148 sps:$4 sm:$0xff]  }
 0x2e9   : > { %2567 = vmatpush1.bf16.msra.mxu0 %v4059_v48  ;;  %v4097_v23 = vld [vmem:[#allocation15 + $0x38c] ss:$148 sps:$4 sm:$0xff]   ;;  %v4095_v25 = vld [vmem:[#allocation15 + $0x388] ss:$148 sps:$4 sm:$0xff]   ;;  %v4125_v26 = vld [vmem:[#allocation15 + $0x144] ss:$148 sps:$4 sm:$0xff]  }
 0x2ea   : > { %2568 = vmatprep.subr.bf16.mxu0 %v4060_v51  ;;  %v4103_v27 = vld [vmem:[#allocation15 + $0x4b4] ss:$148 sps:$4 sm:$0xff]   ;;  %v4101_v29 = vld [vmem:[#allocation15 + $0x4b0] ss:$148 sps:$4 sm:$0xff]   ;;  %v4131_v30 = vld [vmem:[#allocation15 + $0x26c] ss:$148 sps:$4 sm:$0xff]  }
 0x2eb   : > { %2608 = vmatpush1.bf16.msra.mxu1 %v4092_v2  ;;  %v4123_v28 = vld [vmem:[#allocation15 + $0x140] ss:$148 sps:$4 sm:$0xff]   ;;  %v4109_v31 = vld [vmem:[#allocation15 + $0x5dc] ss:$148 sps:$4 sm:$0xff]   ;;  %v4107_v33 = vld [vmem:[#allocation15 + $0x5d8] ss:$148 sps:$4 sm:$0xff]  }
 0x2ec   : > { %2609 = vmatprep.subr.bf16.mxu1 %v4093_v4  ;;  %v4129_v32 = vld [vmem:[#allocation15 + $0x268] ss:$148 sps:$4 sm:$0xff]   ;;  %v4115_v35 = vld [vmem:[#allocation15 + $0x704] ss:$148 sps:$4 sm:$0xff]   ;;  %v4113_v37 = vld [vmem:[#allocation15 + $0x700] ss:$148 sps:$4 sm:$0xff]  }
 0x2ed   : > { %2569 = vmatpush1.bf16.msra.mxu0 %v4062_v52  ;;  %v4137_v34 = vld [vmem:[#allocation15 + $0x394] ss:$148 sps:$4 sm:$0xff]   ;;  %v4135_v36 = vld [vmem:[#allocation15 + $0x390] ss:$148 sps:$4 sm:$0xff]   ;;  %v4119_v39 = vld [vmem:[#allocation15 + $0x82c] ss:$148 sps:$4 sm:$0xff]  }
 0x2ee   : > { %2570 = vmatprep.subr.bf16.mxu0 %v4063_v54  ;;  %v4143_v38 = vld [vmem:[#allocation15 + $0x4bc] ss:$148 sps:$4 sm:$0xff]   ;;  %v4141_v40 = vld [vmem:[#allocation15 + $0x4b8] ss:$148 sps:$4 sm:$0xff]   ;;  %v4147_v45 = vld [vmem:[#allocation15 + $0x5e0] ss:$148 sps:$4 sm:$0xff]  }
 0x2ef   : > { %2610 = vmatpush1.bf16.msra.mxu1 %v4098_v8  ;;  %v4117_v41 = vld [vmem:[#allocation15 + $0x828] ss:$148 sps:$4 sm:$0xff]   ;;  %v4149_v43 = vld [vmem:[#allocation15 + $0x5e4] ss:$148 sps:$4 sm:$0xff]   ;;  %v4126_v46 = vld [vmem:[#allocation15 + $0x20] ss:$148 sps:$4 sm:$0xff]  }
 0x2f0   : > { %2611 = vmatprep.subr.bf16.mxu1 %v4099_v9  ;;  %v4128_v44 = vld [vmem:[#allocation15 + $0x24] ss:$148 sps:$4 sm:$0xff]   ;;  %v4155_v47 = vld [vmem:[#allocation15 + $0x70c] ss:$148 sps:$4 sm:$0xff]   ;;  %v4153_v49 = vld [vmem:[#allocation15 + $0x708] ss:$148 sps:$4 sm:$0xff]  }
 0x2f1   : > { %2571 = vmatpush1.bf16.msra.mxu0 %v4065_v59  ;;  %v4134_v48 = vld [vmem:[#allocation15 + $0x14c] ss:$148 sps:$4 sm:$0xff]   ;;  %v4132_v50 = vld [vmem:[#allocation15 + $0x148] ss:$148 sps:$4 sm:$0xff]   ;;  %v4159_v53 = vld [vmem:[#allocation15 + $0x830] ss:$148 sps:$4 sm:$0xff]  }
 0x2f2   : > { %2572 = vmatprep.subr.bf16.mxu0 %v4066_v0  ;;  %v4161_v51 = vld [vmem:[#allocation15 + $0x834] ss:$148 sps:$4 sm:$0xff]   ;;  %v4138_v54 = vld [vmem:[#allocation15 + $0x270] ss:$148 sps:$4 sm:$0xff]   ;;  %v4170_v55 = vld [vmem:[#allocation15 + $0x2c] ss:$148 sps:$4 sm:$0xff]  }
 0x2f3   : > { %2612 = vmatpush1.bf16.msra.mxu1 %v4104_v12  ;;  %v4140_v52 = vld [vmem:[#allocation15 + $0x274] ss:$148 sps:$4 sm:$0xff]   ;;  %v4146_v56 = vld [vmem:[#allocation15 + $0x39c] ss:$148 sps:$4 sm:$0xff]   ;;  %v4144_v58 = vld [vmem:[#allocation15 + $0x398] ss:$148 sps:$4 sm:$0xff]  }
 0x2f4   : > { %2613 = vmatprep.subr.bf16.mxu1 %v4105_v14  ;;  %v4168_v57 = vld [vmem:[#allocation15 + $0x28] ss:$148 sps:$4 sm:$0xff]   ;;  %v4152_v60 = vld [vmem:[#allocation15 + $0x4c4] ss:$148 sps:$4 sm:$0xff]   ;;  %v4150_v62 = vld [vmem:[#allocation15 + $0x4c0] ss:$148 sps:$4 sm:$0xff]  }
 0x2f5   : > { %2573 = vmatpush1.bf16.msra.mxu0 %v4068_v3  ;;  %v4173_v59 = vld [vmem:[#allocation15 + $0x154] ss:$148 sps:$4 sm:$0xff]   ;;  %v4171_v61 = vld [vmem:[#allocation15 + $0x150] ss:$148 sps:$4 sm:$0xff]   ;;  %v4158_v0 = vld [vmem:[#allocation15 + $0x5ec] ss:$148 sps:$4 sm:$0xff]  }
 0x2f6   : > { %2574 = vmatprep.subr.bf16.mxu0 %v4069_v5  ;;  %v4179_v63 = vld [vmem:[#allocation15 + $0x27c] ss:$148 sps:$4 sm:$0xff]   ;;  %v4177_v1 = vld [vmem:[#allocation15 + $0x278] ss:$148 sps:$4 sm:$0xff]   ;;  %v4164_v4 = vld [vmem:[#allocation15 + $0x714] ss:$148 sps:$4 sm:$0xff]  }
 0x2f7   : > { %2614 = vmatpush1.bf16.msra.mxu1 %v4110_v16  ;;  %v4156_v2 = vld [vmem:[#allocation15 + $0x5e8] ss:$148 sps:$4 sm:$0xff]   ;;  %v4185_v3 = vld [vmem:[#allocation15 + $0x3a4] ss:$148 sps:$4 sm:$0xff]   ;;  %v4183_v5 = vld [vmem:[#allocation15 + $0x3a0] ss:$148 sps:$4 sm:$0xff]  }
 0x2f8   : > { %2615 = vmatprep.subr.bf16.mxu1 %v4111_v18  ;;  %v4191_v7 = vld [vmem:[#allocation15 + $0x4cc] ss:$148 sps:$4 sm:$0xff]   ;;  %v4167_v8 = vld [vmem:[#allocation15 + $0x83c] ss:$148 sps:$4 sm:$0xff]   ;;  %v4197_v12 = vld [vmem:[#allocation15 + $0x5f4] ss:$148 sps:$4 sm:$0xff]  }
 0x2f9   : > { %2575 = vmatpush1.bf16.msra.mxu0 %v4073_v6  ;;  %v4162_v6 = vld [vmem:[#allocation15 + $0x710] ss:$148 sps:$4 sm:$0xff]   ;;  %v4189_v9 = vld [vmem:[#allocation15 + $0x4c8] ss:$148 sps:$4 sm:$0xff]   ;;  %v4201_v18 = vld [vmem:[#allocation15 + $0x718] ss:$148 sps:$4 sm:$0xff]  }
 0x2fa   : > { %2642 = vmatprep.subr.bf16.mxu0 %v4079_v10  ;;  %v4165_v10 = vld [vmem:[#allocation15 + $0x838] ss:$148 sps:$4 sm:$0xff]   ;;  %v4195_v14 = vld [vmem:[#allocation15 + $0x5f0] ss:$148 sps:$4 sm:$0xff]  }
 0x2fb   : > { %2616 = vmatpush1.bf16.msra.mxu1 %v4116_v20  ;;  %v4203_v16 = vld [vmem:[#allocation15 + $0x71c] ss:$148 sps:$4 sm:$0xff]   ;;  %v4209_v20 = vld [vmem:[#allocation15 + $0x844] ss:$148 sps:$4 sm:$0xff]  }
 0x2fc   : > { %2593 = vmatmul.mubr.bf16.vlgmr.msra.gmra.mrb[0].mxu0 %v4966_v11  ;;  %2683 = vmatprep.subr.bf16.mxu1 %v4122_v22  ;;  %v4207_v22 = vld [vmem:[#allocation15 + $0x840] ss:$148 sps:$4 sm:$0xff]  }
 0x2fd   : > { %2643 = vmatpush1.bf16.msra.mxu0 %v4077_v13  ;;  %2674 = vmatprep.mubr.bf16.mxu0 %v4738_v42  ;;  %v4176_v13 = vld [vmem:[#allocation15 + $0x34] ss:$148 sps:$4 sm:$0xff]  }
 0x2fe   : > { %2644 = vmatprep.subr.bf16.mxu0 %v4085_v15  ;;  %2634 = vmatmul.mubr.bf16.vlgmr.msra.gmra.mrb[0].mxu1 %v4966_v11  ;;  %v4174_v15 = vld [vmem:[#allocation15 + $0x30] ss:$148 sps:$4 sm:$0xff]  }
 0x2ff   : > { %2684 = vmatpush1.bf16.msra.mxu1 %v4120_v24  ;;  %2715 = vmatprep.mubr.bf16.mxu1 %v4738_v42  ;;  %v4218_v24 = vld [vmem:[#allocation15 + $0x3c] ss:$148 sps:$4 sm:$0xff]  }
 0x300   : > { %2685 = vmatprep.subr.bf16.mxu1 %v4125_v26  ;;  %v4216_v26 = vld [vmem:[#allocation15 + $0x38] ss:$148 sps:$4 sm:$0xff]  }
 0x301   : > { %2645 = vmatpush1.bf16.msra.mxu0 %v4083_v17  ;;  %v4182_v17 = vld [vmem:[#allocation15 + $0x15c] ss:$148 sps:$4 sm:$0xff]  }
 0x302   : > { %2646 = vmatprep.subr.bf16.mxu0 %v4091_v19  ;;  %v4180_v19 = vld [vmem:[#allocation15 + $0x158] ss:$148 sps:$4 sm:$0xff]  }
 0x303   : > { %2686 = vmatpush1.bf16.msra.mxu1 %v4123_v28  ;;  %v4221_v28 = vld [vmem:[#allocation15 + $0x164] ss:$148 sps:$4 sm:$0xff]  }
 0x304   : > { %2687 = vmatprep.subr.bf16.mxu1 %v4131_v30  ;;  %v4219_v30 = vld [vmem:[#allocation15 + $0x160] ss:$148 sps:$4 sm:$0xff]  }
 0x305   : > { %2647 = vmatpush1.bf16.msra.mxu0 %v4089_v21  ;;  %v4188_v21 = vld [vmem:[#allocation15 + $0x284] ss:$148 sps:$4 sm:$0xff]  }
 0x306   : > { %2648 = vmatprep.subr.bf16.mxu0 %v4097_v23  ;;  %v4186_v23 = vld [vmem:[#allocation15 + $0x280] ss:$148 sps:$4 sm:$0xff]  }
 0x307   : > { %2688 = vmatpush1.bf16.msra.mxu1 %v4129_v32  ;;  %v4227_v32 = vld [vmem:[#allocation15 + $0x28c] ss:$148 sps:$4 sm:$0xff]  }
 0x308   : > { %2689 = vmatprep.subr.bf16.mxu1 %v4137_v34  ;;  %v4225_v34 = vld [vmem:[#allocation15 + $0x288] ss:$148 sps:$4 sm:$0xff]  }
 0x309   : > { %2649 = vmatpush1.bf16.msra.mxu0 %v4095_v25  ;;  %v4194_v25 = vld [vmem:[#allocation15 + $0x3ac] ss:$148 sps:$4 sm:$0xff]  }
 0x30a   : > { %2650 = vmatprep.subr.bf16.mxu0 %v4103_v27  ;;  %v4192_v27 = vld [vmem:[#allocation15 + $0x3a8] ss:$148 sps:$4 sm:$0xff]  }
 0x30b   : > { %2690 = vmatpush1.bf16.msra.mxu1 %v4135_v36  ;;  %v4233_v36 = vld [vmem:[#allocation15 + $0x3b4] ss:$148 sps:$4 sm:$0xff]  }
 0x30c   : > { %2691 = vmatprep.subr.bf16.mxu1 %v4143_v38  ;;  %v4231_v38 = vld [vmem:[#allocation15 + $0x3b0] ss:$148 sps:$4 sm:$0xff]  }
 0x30d   : > { %2651 = vmatpush1.bf16.msra.mxu0 %v4101_v29  ;;  %v4200_v29 = vld [vmem:[#allocation15 + $0x4d4] ss:$148 sps:$4 sm:$0xff]  }
 0x30e   : > { %2652 = vmatprep.subr.bf16.mxu0 %v4109_v31  ;;  %v4198_v31 = vld [vmem:[#allocation15 + $0x4d0] ss:$148 sps:$4 sm:$0xff]  }
 0x30f   : > { %2692 = vmatpush1.bf16.msra.mxu1 %v4141_v40  ;;  %v4239_v40 = vld [vmem:[#allocation15 + $0x4dc] ss:$148 sps:$4 sm:$0xff]  }
 0x310   : > { %2693 = vmatprep.subr.bf16.mxu1 %v4149_v43  ;;  %v4237_v43 = vld [vmem:[#allocation15 + $0x4d8] ss:$148 sps:$4 sm:$0xff]  }
 0x311   : > { %2653 = vmatpush1.bf16.msra.mxu0 %v4107_v33  ;;  %v4206_v33 = vld [vmem:[#allocation15 + $0x5fc] ss:$148 sps:$4 sm:$0xff]  }
 0x312   : > { %2654 = vmatprep.subr.bf16.mxu0 %v4115_v35  ;;  %v4204_v35 = vld [vmem:[#allocation15 + $0x5f8] ss:$148 sps:$4 sm:$0xff]  }
 0x313   : > { %2694 = vmatpush1.bf16.msra.mxu1 %v4147_v45  ;;  %v4245_v45 = vld [vmem:[#allocation15 + $0x604] ss:$148 sps:$4 sm:$0xff]  }
 0x314   : > { %2695 = vmatprep.subr.bf16.mxu1 %v4155_v47  ;;  %v4243_v47 = vld [vmem:[#allocation15 + $0x600] ss:$148 sps:$4 sm:$0xff]  }
 0x315   : > { %2655 = vmatpush1.bf16.msra.mxu0 %v4113_v37  ;;  %v4212_v37 = vld [vmem:[#allocation15 + $0x724] ss:$148 sps:$4 sm:$0xff]  }
 0x316   : > { %2656 = vmatprep.subr.bf16.mxu0 %v4119_v39  ;;  %v4210_v39 = vld [vmem:[#allocation15 + $0x720] ss:$148 sps:$4 sm:$0xff]  }
 0x317   : > { %2696 = vmatpush1.bf16.msra.mxu1 %v4153_v49  ;;  %v4251_v49 = vld [vmem:[#allocation15 + $0x72c] ss:$148 sps:$4 sm:$0xff]  }
 0x318   : > { %2697 = vmatprep.subr.bf16.mxu1 %v4161_v51  ;;  %v4249_v51 = vld [vmem:[#allocation15 + $0x728] ss:$148 sps:$4 sm:$0xff]  }
 0x319   : > { %2657 = vmatpush1.bf16.msra.mxu0 %v4117_v41  ;;  %v4215_v41 = vld [vmem:[#allocation15 + $0x84c] ss:$148 sps:$4 sm:$0xff]  }
 0x31a   : > { %2724 = vmatprep.subr.bf16.mxu0 %v4128_v44  ;;  %v4213_v44 = vld [vmem:[#allocation15 + $0x848] ss:$148 sps:$4 sm:$0xff]  }
 0x31b   : > { %2698 = vmatpush1.bf16.msra.mxu1 %v4159_v53  ;;  %v4257_v53 = vld [vmem:[#allocation15 + $0x854] ss:$148 sps:$4 sm:$0xff]  }
 0x31c   : > { %2675 = vmatmul.mubr.bf16.vlgmr.msra.gmra.mrb[4].mxu0 %v4966_v11  ;;  %2765 = vmatprep.subr.bf16.mxu1 %v4170_v55  ;;  %v4255_v55 = vld [vmem:[#allocation15 + $0x850] ss:$148 sps:$4 sm:$0xff]  }
 0x31d   : > { %2725 = vmatpush1.bf16.msra.mxu0 %v4126_v46  ;;  %2756 = vmatprep.mubr.bf16.mxu0 %v4738_v42  ;;  %v4224_v46 = vld [vmem:[#allocation15 + $0x44] ss:$148 sps:$4 sm:$0xff]  }
 0x31e   : > { %2726 = vmatprep.subr.bf16.mxu0 %v4134_v48  ;;  %2716 = vmatmul.mubr.bf16.vlgmr.msra.gmra.mrb[4].mxu1 %v4966_v11  ;;  %v4222_v48 = vld [vmem:[#allocation15 + $0x40] ss:$148 sps:$4 sm:$0xff]  }
 0x31f   : > { %2766 = vmatpush1.bf16.msra.mxu1 %v4168_v57  ;;  %2797 = vmatprep.mubr.bf16.mxu1 %v4738_v42  ;;  %v4266_v57 = vld [vmem:[#allocation15 + $0x4c] ss:$148 sps:$4 sm:$0xff]  }
 0x320   : > { %2767 = vmatprep.subr.bf16.mxu1 %v4173_v59  ;;  %v4264_v59 = vld [vmem:[#allocation15 + $0x48] ss:$148 sps:$4 sm:$0xff]  }
 0x321   : > { %2727 = vmatpush1.bf16.msra.mxu0 %v4132_v50  ;;  %v4230_v50 = vld [vmem:[#allocation15 + $0x16c] ss:$148 sps:$4 sm:$0xff]  }
 0x322   : > { %2728 = vmatprep.subr.bf16.mxu0 %v4140_v52  ;;  %v4228_v52 = vld [vmem:[#allocation15 + $0x168] ss:$148 sps:$4 sm:$0xff]  }
 0x323   : > { %2768 = vmatpush1.bf16.msra.mxu1 %v4171_v61  ;;  %v4269_v61 = vld [vmem:[#allocation15 + $0x174] ss:$148 sps:$4 sm:$0xff]  }
 0x324   : > { %2769 = vmatprep.subr.bf16.mxu1 %v4179_v63  ;;  %v4267_v63 = vld [vmem:[#allocation15 + $0x170] ss:$148 sps:$4 sm:$0xff]  }
 0x325   : > { %2729 = vmatpush1.bf16.msra.mxu0 %v4138_v54  ;;  %v4236_v54 = vld [vmem:[#allocation15 + $0x294] ss:$148 sps:$4 sm:$0xff]  }
 0x326   : > { %2730 = vmatprep.subr.bf16.mxu0 %v4146_v56  ;;  %v4234_v56 = vld [vmem:[#allocation15 + $0x290] ss:$148 sps:$4 sm:$0xff]  }
 0x327   : > { %2770 = vmatpush1.bf16.msra.mxu1 %v4177_v1  ;;  %v4275_v1 = vld [vmem:[#allocation15 + $0x29c] ss:$148 sps:$4 sm:$0xff]  }
 0x328   : > { %2771 = vmatprep.subr.bf16.mxu1 %v4185_v3  ;;  %v4273_v3 = vld [vmem:[#allocation15 + $0x298] ss:$148 sps:$4 sm:$0xff]  }
 0x329   : > { %2731 = vmatpush1.bf16.msra.mxu0 %v4144_v58  ;;  %v4242_v58 = vld [vmem:[#allocation15 + $0x3bc] ss:$148 sps:$4 sm:$0xff]  }
 0x32a   : > { %2732 = vmatprep.subr.bf16.mxu0 %v4152_v60  ;;  %v4240_v60 = vld [vmem:[#allocation15 + $0x3b8] ss:$148 sps:$4 sm:$0xff]  }
 0x32b   : > { %2772 = vmatpush1.bf16.msra.mxu1 %v4183_v5  ;;  %v4281_v5 = vld [vmem:[#allocation15 + $0x3c4] ss:$148 sps:$4 sm:$0xff]  }
 0x32c   : > { %2773 = vmatprep.subr.bf16.mxu1 %v4191_v7  ;;  %v4279_v7 = vld [vmem:[#allocation15 + $0x3c0] ss:$148 sps:$4 sm:$0xff]  }
 0x32d   : > { %2733 = vmatpush1.bf16.msra.mxu0 %v4150_v62  ;;  %v4248_v62 = vld [vmem:[#allocation15 + $0x4e4] ss:$148 sps:$4 sm:$0xff]  }
 0x32e   : > { %2734 = vmatprep.subr.bf16.mxu0 %v4158_v0  ;;  %v4246_v0 = vld [vmem:[#allocation15 + $0x4e0] ss:$148 sps:$4 sm:$0xff]  }
 0x32f   : > { %2774 = vmatpush1.bf16.msra.mxu1 %v4189_v9  ;;  %v4287_v9 = vld [vmem:[#allocation15 + $0x4ec] ss:$148 sps:$4 sm:$0xff]  }
 0x330   : > { %2775 = vmatprep.subr.bf16.mxu1 %v4197_v12  ;;  %v4285_v12 = vld [vmem:[#allocation15 + $0x4e8] ss:$148 sps:$4 sm:$0xff]  }
 0x331   : > { %2735 = vmatpush1.bf16.msra.mxu0 %v4156_v2  ;;  %v4254_v2 = vld [vmem:[#allocation15 + $0x60c] ss:$148 sps:$4 sm:$0xff]  }
 0x332   : > { %2736 = vmatprep.subr.bf16.mxu0 %v4164_v4  ;;  %v4252_v4 = vld [vmem:[#allocation15 + $0x608] ss:$148 sps:$4 sm:$0xff]  }
 0x333   : > { %2776 = vmatpush1.bf16.msra.mxu1 %v4195_v14  ;;  %v4293_v14 = vld [vmem:[#allocation15 + $0x614] ss:$148 sps:$4 sm:$0xff]  }
 0x334   : > { %2777 = vmatprep.subr.bf16.mxu1 %v4203_v16  ;;  %v4291_v16 = vld [vmem:[#allocation15 + $0x610] ss:$148 sps:$4 sm:$0xff]  }
 0x335   : > { %2737 = vmatpush1.bf16.msra.mxu0 %v4162_v6  ;;  %v4260_v6 = vld [vmem:[#allocation15 + $0x734] ss:$148 sps:$4 sm:$0xff]  }
 0x336   : > { %2738 = vmatprep.subr.bf16.mxu0 %v4167_v8  ;;  %v4258_v8 = vld [vmem:[#allocation15 + $0x730] ss:$148 sps:$4 sm:$0xff]  }
 0x337   : > { %2778 = vmatpush1.bf16.msra.mxu1 %v4201_v18  ;;  %v4299_v18 = vld [vmem:[#allocation15 + $0x73c] ss:$148 sps:$4 sm:$0xff]  }
 0x338   : > { %2779 = vmatprep.subr.bf16.mxu1 %v4209_v20  ;;  %v4297_v20 = vld [vmem:[#allocation15 + $0x738] ss:$148 sps:$4 sm:$0xff]  }
 0x339   : > { %2739 = vmatpush1.bf16.msra.mxu0 %v4165_v10  ;;  %v4263_v10 = vld [vmem:[#allocation15 + $0x85c] ss:$148 sps:$4 sm:$0xff]  }
 0x33a   : > { %2806 = vmatprep.subr.bf16.mxu0 %v4176_v13  ;;  %v4261_v13 = vld [vmem:[#allocation15 + $0x858] ss:$148 sps:$4 sm:$0xff]  }
 0x33b   : > { %2780 = vmatpush1.bf16.msra.mxu1 %v4207_v22  ;;  %v4305_v22 = vld [vmem:[#allocation15 + $0x864] ss:$148 sps:$4 sm:$0xff]  }
 0x33c   : > { %2757 = vmatmul.mubr.bf16.vlgmr.msra.gmra.mrb[8].mxu0 %v4966_v11  ;;  %2847 = vmatprep.subr.bf16.mxu1 %v4218_v24  ;;  %v4303_v24 = vld [vmem:[#allocation15 + $0x860] ss:$148 sps:$4 sm:$0xff]  }
 0x33d   : > { %2807 = vmatpush1.bf16.msra.mxu0 %v4174_v15  ;;  %2838 = vmatprep.mubr.bf16.mxu0 %v4738_v42  ;;  %v4272_v15 = vld [vmem:[#allocation15 + $0x54] ss:$148 sps:$4 sm:$0xff]  }
 0x33e   : > { %2808 = vmatprep.subr.bf16.mxu0 %v4182_v17  ;;  %2798 = vmatmul.mubr.bf16.vlgmr.msra.gmra.mrb[8].mxu1 %v4966_v11  ;;  %v4270_v17 = vld [vmem:[#allocation15 + $0x50] ss:$148 sps:$4 sm:$0xff]  }
 0x33f   : > { %2848 = vmatpush1.bf16.msra.mxu1 %v4216_v26  ;;  %2879 = vmatprep.mubr.bf16.mxu1 %v4738_v42  ;;  %v4314_v26 = vld [vmem:[#allocation15 + $0x5c] ss:$148 sps:$4 sm:$0xff]  }
 0x340   : > { %2849 = vmatprep.subr.bf16.mxu1 %v4221_v28  ;;  %v4312_v28 = vld [vmem:[#allocation15 + $0x58] ss:$148 sps:$4 sm:$0xff]  }
 0x341   : > { %2809 = vmatpush1.bf16.msra.mxu0 %v4180_v19  ;;  %v4278_v19 = vld [vmem:[#allocation15 + $0x17c] ss:$148 sps:$4 sm:$0xff]  }
 0x342   : > { %2810 = vmatprep.subr.bf16.mxu0 %v4188_v21  ;;  %v4276_v21 = vld [vmem:[#allocation15 + $0x178] ss:$148 sps:$4 sm:$0xff]  }
 0x343   : > { %2850 = vmatpush1.bf16.msra.mxu1 %v4219_v30  ;;  %v4317_v30 = vld [vmem:[#allocation15 + $0x184] ss:$148 sps:$4 sm:$0xff]  }
 0x344   : > { %2851 = vmatprep.subr.bf16.mxu1 %v4227_v32  ;;  %v4315_v32 = vld [vmem:[#allocation15 + $0x180] ss:$148 sps:$4 sm:$0xff]  }
 0x345   : > { %2811 = vmatpush1.bf16.msra.mxu0 %v4186_v23  ;;  %v4284_v23 = vld [vmem:[#allocation15 + $0x2a4] ss:$148 sps:$4 sm:$0xff]  }
 0x346   : > { %2812 = vmatprep.subr.bf16.mxu0 %v4194_v25  ;;  %v4282_v25 = vld [vmem:[#allocation15 + $0x2a0] ss:$148 sps:$4 sm:$0xff]  }
 0x347   : > { %2852 = vmatpush1.bf16.msra.mxu1 %v4225_v34  ;;  %v4323_v34 = vld [vmem:[#allocation15 + $0x2ac] ss:$148 sps:$4 sm:$0xff]  }
 0x348   : > { %2853 = vmatprep.subr.bf16.mxu1 %v4233_v36  ;;  %v4321_v36 = vld [vmem:[#allocation15 + $0x2a8] ss:$148 sps:$4 sm:$0xff]  }
 0x349   : > { %2813 = vmatpush1.bf16.msra.mxu0 %v4192_v27  ;;  %v4290_v27 = vld [vmem:[#allocation15 + $0x3cc] ss:$148 sps:$4 sm:$0xff]  }
 0x34a   : > { %2814 = vmatprep.subr.bf16.mxu0 %v4200_v29  ;;  %v4288_v29 = vld [vmem:[#allocation15 + $0x3c8] ss:$148 sps:$4 sm:$0xff]  }
 0x34b   : > { %2854 = vmatpush1.bf16.msra.mxu1 %v4231_v38  ;;  %v4329_v38 = vld [vmem:[#allocation15 + $0x3d4] ss:$148 sps:$4 sm:$0xff]  }
 0x34c   : > { %2855 = vmatprep.subr.bf16.mxu1 %v4239_v40  ;;  %v4327_v40 = vld [vmem:[#allocation15 + $0x3d0] ss:$148 sps:$4 sm:$0xff]  }
 0x34d   : > { %2815 = vmatpush1.bf16.msra.mxu0 %v4198_v31  ;;  %v4296_v31 = vld [vmem:[#allocation15 + $0x4f4] ss:$148 sps:$4 sm:$0xff]  }
 0x34e   : > { %2816 = vmatprep.subr.bf16.mxu0 %v4206_v33  ;;  %v4294_v33 = vld [vmem:[#allocation15 + $0x4f0] ss:$148 sps:$4 sm:$0xff]  }
 0x34f   : > { %2856 = vmatpush1.bf16.msra.mxu1 %v4237_v43  ;;  %v4335_v43 = vld [vmem:[#allocation15 + $0x4fc] ss:$148 sps:$4 sm:$0xff]  }
 0x350   : > { %2857 = vmatprep.subr.bf16.mxu1 %v4245_v45  ;;  %v4333_v45 = vld [vmem:[#allocation15 + $0x4f8] ss:$148 sps:$4 sm:$0xff]  }
 0x351   : > { %2817 = vmatpush1.bf16.msra.mxu0 %v4204_v35  ;;  %v4302_v35 = vld [vmem:[#allocation15 + $0x61c] ss:$148 sps:$4 sm:$0xff]  }
 0x352   : > { %2818 = vmatprep.subr.bf16.mxu0 %v4212_v37  ;;  %v4300_v37 = vld [vmem:[#allocation15 + $0x618] ss:$148 sps:$4 sm:$0xff]  }
 0x353   : > { %2858 = vmatpush1.bf16.msra.mxu1 %v4243_v47  ;;  %v4341_v47 = vld [vmem:[#allocation15 + $0x624] ss:$148 sps:$4 sm:$0xff]  }
 0x354   : > { %2859 = vmatprep.subr.bf16.mxu1 %v4251_v49  ;;  %v4318_v49 = vld [vmem:[#allocation15 + $0x60] ss:$148 sps:$4 sm:$0xff]  }
 0x355   : > { %2819 = vmatpush1.bf16.msra.mxu0 %v4210_v39  ;;  %v4308_v39 = vld [vmem:[#allocation15 + $0x744] ss:$148 sps:$4 sm:$0xff]  }
 0x356   : > { %2820 = vmatprep.subr.bf16.mxu0 %v4215_v41  ;;  %v4306_v41 = vld [vmem:[#allocation15 + $0x740] ss:$148 sps:$4 sm:$0xff]  }
 0x357   : > { %2860 = vmatpush1.bf16.msra.mxu1 %v4249_v51  ;;  %v4347_v51 = vld [vmem:[#allocation15 + $0x74c] ss:$148 sps:$4 sm:$0xff]  }
 0x358   : > { %2861 = vmatprep.subr.bf16.mxu1 %v4257_v53  ;;  %v4345_v53 = vld [vmem:[#allocation15 + $0x748] ss:$148 sps:$4 sm:$0xff]  }
 0x359   : > { %2821 = vmatpush1.bf16.msra.mxu0 %v4213_v44  ;;  %v4311_v44 = vld [vmem:[#allocation15 + $0x86c] ss:$148 sps:$4 sm:$0xff]  }
 0x35a   : > { %2888 = vmatprep.subr.bf16.mxu0 %v4224_v46  ;;  %v4309_v46 = vld [vmem:[#allocation15 + $0x868] ss:$148 sps:$4 sm:$0xff]  }
 0x35b   : > { %2862 = vmatpush1.bf16.msra.mxu1 %v4255_v55  ;;  %v4353_v55 = vld [vmem:[#allocation15 + $0x874] ss:$148 sps:$4 sm:$0xff]  }
 0x35c   : > { %2839 = vmatmul.mubr.bf16.vlgmr.msra.gmra.mrb[12].mxu0 %v4966_v11  ;;  %2929 = vmatprep.subr.bf16.mxu1 %v4266_v57  ;;  %v4351_v57 = vld [vmem:[#allocation15 + $0x870] ss:$148 sps:$4 sm:$0xff]  }
 0x35d   : > { %2889 = vmatpush1.bf16.msra.mxu0 %v4222_v48  ;;  %2920 = vmatprep.mubr.bf16.mxu0 %v4738_v42  ;;  %v4320_v48 = vld [vmem:[#allocation15 + $0x64] ss:$148 sps:$4 sm:$0xff]  }
 0x35e   : > { %2890 = vmatprep.subr.bf16.mxu0 %v4230_v50  ;;  %2880 = vmatmul.mubr.bf16.vlgmr.msra.gmra.mrb[12].mxu1 %v4966_v11  ;;  %v4339_v50 = vld [vmem:[#allocation15 + $0x620] ss:$148 sps:$4 sm:$0xff]  }
 0x35f   : > { %2930 = vmatpush1.bf16.msra.mxu1 %v4264_v59  ;;  %2961 = vmatprep.mubr.bf16.mxu1 %v4738_v42  ;;  %v4362_v59 = vld [vmem:[#allocation15 + $0x6c] ss:$148 sps:$4 sm:$0xff]  }
 0x360   : > { %2931 = vmatprep.subr.bf16.mxu1 %v4269_v61  ;;  %v4360_v61 = vld [vmem:[#allocation15 + $0x68] ss:$148 sps:$4 sm:$0xff]  }
 0x361   : > { %2891 = vmatpush1.bf16.msra.mxu0 %v4228_v52  ;;  %v4326_v52 = vld [vmem:[#allocation15 + $0x18c] ss:$148 sps:$4 sm:$0xff]  }
 0x362   : > { %2892 = vmatprep.subr.bf16.mxu0 %v4236_v54  ;;  %v4324_v54 = vld [vmem:[#allocation15 + $0x188] ss:$148 sps:$4 sm:$0xff]  }
 0x363   : > { %2932 = vmatpush1.bf16.msra.mxu1 %v4267_v63  ;;  %v4365_v63 = vld [vmem:[#allocation15 + $0x194] ss:$148 sps:$4 sm:$0xff]  }
 0x364   : > { %2933 = vmatprep.subr.bf16.mxu1 %v4275_v1  ;;  %v4363_v1 = vld [vmem:[#allocation15 + $0x190] ss:$148 sps:$4 sm:$0xff]  }
 0x365   : > { %2893 = vmatpush1.bf16.msra.mxu0 %v4234_v56  ;;  %v4332_v56 = vld [vmem:[#allocation15 + $0x2b4] ss:$148 sps:$4 sm:$0xff]  }
 0x366   : > { %2894 = vmatprep.subr.bf16.mxu0 %v4242_v58  ;;  %v4330_v58 = vld [vmem:[#allocation15 + $0x2b0] ss:$148 sps:$4 sm:$0xff]  }
 0x367   : > { %2934 = vmatpush1.bf16.msra.mxu1 %v4273_v3  ;;  %v4371_v3 = vld [vmem:[#allocation15 + $0x2bc] ss:$148 sps:$4 sm:$0xff]  }
 0x368   : > { %2935 = vmatprep.subr.bf16.mxu1 %v4281_v5  ;;  %v4369_v5 = vld [vmem:[#allocation15 + $0x2b8] ss:$148 sps:$4 sm:$0xff]  }
 0x369   : > { %2895 = vmatpush1.bf16.msra.mxu0 %v4240_v60  ;;  %v4338_v60 = vld [vmem:[#allocation15 + $0x3dc] ss:$148 sps:$4 sm:$0xff]  }
 0x36a   : > { %2896 = vmatprep.subr.bf16.mxu0 %v4248_v62  ;;  %v4336_v62 = vld [vmem:[#allocation15 + $0x3d8] ss:$148 sps:$4 sm:$0xff]  }
 0x36b   : > { %2936 = vmatpush1.bf16.msra.mxu1 %v4279_v7  ;;  %v4377_v7 = vld [vmem:[#allocation15 + $0x3e4] ss:$148 sps:$4 sm:$0xff]  }
 0x36c   : > { %2937 = vmatprep.subr.bf16.mxu1 %v4287_v9  ;;  %v4375_v9 = vld [vmem:[#allocation15 + $0x3e0] ss:$148 sps:$4 sm:$0xff]  }
 0x36d   : > { %2897 = vmatpush1.bf16.msra.mxu0 %v4246_v0  ;;  %v4344_v0 = vld [vmem:[#allocation15 + $0x504] ss:$148 sps:$4 sm:$0xff]  }
 0x36e   : > { %2898 = vmatprep.subr.bf16.mxu0 %v4254_v2  ;;  %v4342_v2 = vld [vmem:[#allocation15 + $0x500] ss:$148 sps:$4 sm:$0xff]  }
 0x36f   : > { %2938 = vmatpush1.bf16.msra.mxu1 %v4285_v12  ;;  %v4383_v12 = vld [vmem:[#allocation15 + $0x50c] ss:$148 sps:$4 sm:$0xff]  }
 0x370   : > { %2939 = vmatprep.subr.bf16.mxu1 %v4293_v14  ;;  %v4381_v14 = vld [vmem:[#allocation15 + $0x508] ss:$148 sps:$4 sm:$0xff]  }
 0x371   : > { %2899 = vmatpush1.bf16.msra.mxu0 %v4252_v4  ;;  %v4350_v4 = vld [vmem:[#allocation15 + $0x62c] ss:$148 sps:$4 sm:$0xff]  }
 0x372   : > { %2900 = vmatprep.subr.bf16.mxu0 %v4260_v6  ;;  %v4348_v6 = vld [vmem:[#allocation15 + $0x628] ss:$148 sps:$4 sm:$0xff]  }
 0x373   : > { %2940 = vmatpush1.bf16.msra.mxu1 %v4291_v16  ;;  %v4389_v16 = vld [vmem:[#allocation15 + $0x634] ss:$148 sps:$4 sm:$0xff]  }
 0x374   : > { %2941 = vmatprep.subr.bf16.mxu1 %v4299_v18  ;;  %v4387_v18 = vld [vmem:[#allocation15 + $0x630] ss:$148 sps:$4 sm:$0xff]  }
 0x375   : > { %2901 = vmatpush1.bf16.msra.mxu0 %v4258_v8  ;;  %v4356_v8 = vld [vmem:[#allocation15 + $0x754] ss:$148 sps:$4 sm:$0xff]  }
 0x376   : > { %2902 = vmatprep.subr.bf16.mxu0 %v4263_v10  ;;  %v4354_v10 = vld [vmem:[#allocation15 + $0x750] ss:$148 sps:$4 sm:$0xff]  }
 0x377   : > { %2942 = vmatpush1.bf16.msra.mxu1 %v4297_v20  ;;  %v4395_v20 = vld [vmem:[#allocation15 + $0x75c] ss:$148 sps:$4 sm:$0xff]  }
 0x378   : > { %2943 = vmatprep.subr.bf16.mxu1 %v4305_v22  ;;  %v4393_v22 = vld [vmem:[#allocation15 + $0x758] ss:$148 sps:$4 sm:$0xff]  }
 0x379   : > { %2903 = vmatpush1.bf16.msra.mxu0 %v4261_v13  ;;  %v4359_v13 = vld [vmem:[#allocation15 + $0x87c] ss:$148 sps:$4 sm:$0xff]  }
 0x37a   : > { %2970 = vmatprep.subr.bf16.mxu0 %v4272_v15  ;;  %v4357_v15 = vld [vmem:[#allocation15 + $0x878] ss:$148 sps:$4 sm:$0xff]  }
 0x37b   : > { %2944 = vmatpush1.bf16.msra.mxu1 %v4303_v24  ;;  %v4401_v24 = vld [vmem:[#allocation15 + $0x884] ss:$148 sps:$4 sm:$0xff]  }
 0x37c   : > { %2921 = vmatmul.mubr.bf16.vlgmr.msra.gmra.mrb[16].mxu0 %v4966_v11  ;;  %3011 = vmatprep.subr.bf16.mxu1 %v4314_v26  ;;  %v887_v26 = vlaneseq }
 0x37d   : > { %2971 = vmatpush1.bf16.msra.mxu0 %v4270_v17  ;;  %3002 = vmatprep.mubr.bf16.mxu0 %v4738_v42  ;;  %v4368_v17 = vld [vmem:[#allocation15 + $0x74] ss:$148 sps:$4 sm:$0xff]  }
 0x37e   : > { %2972 = vmatprep.subr.bf16.mxu0 %v4278_v19  ;;  %2962 = vmatmul.mubr.bf16.vlgmr.msra.gmra.mrb[16].mxu1 %v4966_v11  ;;  %v4366_v19 = vld [vmem:[#allocation15 + $0x70] ss:$148 sps:$4 sm:$0xff]  }
 0x37f   : > { %3012 = vmatpush1.bf16.msra.mxu1 %v4312_v28  ;;  %3043 = vmatprep.mubr.bf16.mxu1 %v4738_v42  ;;  %v4378_v28 = vld [vmem:[#allocation15 + $0x2c0] ss:$148 sps:$4 sm:$0xff]  }
 0x380   : > { %3013 = vmatprep.subr.bf16.mxu1 %v4317_v30  ;;  %v4386_v30 = vld [vmem:[#allocation15 + $0x3ec] ss:$148 sps:$4 sm:$0xff]  }
 0x381   : > { %2973 = vmatpush1.bf16.msra.mxu0 %v4276_v21  ;;  %v4374_v21 = vld [vmem:[#allocation15 + $0x19c] ss:$148 sps:$4 sm:$0xff]  }
 0x382   : > { %2974 = vmatprep.subr.bf16.mxu0 %v4284_v23  ;;  %v4372_v23 = vld [vmem:[#allocation15 + $0x198] ss:$148 sps:$4 sm:$0xff]  }
 0x383   : > { %3014 = vmatpush1.bf16.msra.mxu1 %v4315_v32  ;;  %v4408_v32 = vld [vmem:[#allocation15 + $0x78] ss:$148 sps:$4 sm:$0xff]  }
 0x384   : > { %3015 = vmatprep.subr.bf16.mxu1 %v4323_v34  ;;  %v4413_v34 = vld [vmem:[#allocation15 + $0x1a4] ss:$148 sps:$4 sm:$0xff]  }
 0x385   : > { %2975 = vmatpush1.bf16.msra.mxu0 %v4282_v25  ;;  %v4380_v25 = vld [vmem:[#allocation15 + $0x2c4] ss:$148 sps:$4 sm:$0xff]  }
 0x386   : > { %2976 = vmatprep.subr.bf16.mxu0 %v4290_v27  ;;  %v4399_v27 = vld [vmem:[#allocation15 + $0x880] ss:$148 sps:$4 sm:$0xff]  }
 0x387   : > { %3016 = vmatpush1.bf16.msra.mxu1 %v4321_v36 }
 0x388   : > { %3017 = vmatprep.subr.bf16.mxu1 %v4329_v38  ;;  %v4390_v38 = vld [vmem:[#allocation15 + $0x510] ss:$148 sps:$4 sm:$0xff]  }
 0x389   : > { %2977 = vmatpush1.bf16.msra.mxu0 %v4288_v29  ;;  %v4410_v29 = vld [vmem:[#allocation15 + $0x7c] ss:$148 sps:$4 sm:$0xff]  }
 0x38a   : > { %2978 = vmatprep.subr.bf16.mxu0 %v4296_v31  ;;  %v4994_v31 = vshrl.u32 %v887_v26, 7  ;;  %v4440_v26 = vld [vmem:[#allocation15 + $0x524] ss:$148 sps:$4 sm:$0xff]  }
 0x38b   : > { %3018 = vmatpush1.bf16.msra.mxu1 %v4327_v40 }
 0x38c   : > { %3019 = vmatprep.subr.bf16.mxu1 %v4335_v43  ;;  %v4998_v36 = vsub.s32 0, %v4994_v31  ;;  %v5004_v40 = vsub.s32 1, %v4994_v31  ;;  %v4398_v43 = vld [vmem:[#allocation15 + $0x63c] ss:$148 sps:$4 sm:$0xff]  }
 0x38d   : > { %2979 = vmatpush1.bf16.msra.mxu0 %v4294_v33  ;;  %v4384_v33 = vld [vmem:[#allocation15 + $0x3e8] ss:$148 sps:$4 sm:$0xff]  }
 0x38e   : > { %2980 = vmatprep.subr.bf16.mxu0 %v4302_v35  ;;  %v4392_v35 = vld [vmem:[#allocation15 + $0x514] ss:$148 sps:$4 sm:$0xff]  }
 0x38f   : > { %3020 = vmatpush1.bf16.msra.mxu1 %v4333_v45  ;;  %v4417_v45 = vld [vmem:[#allocation15 + $0x2c8] ss:$148 sps:$4 sm:$0xff]  }
 0x390   : > { %3021 = vmatprep.subr.bf16.mxu1 %v4341_v47  ;;  %v4396_v47 = vld [vmem:[#allocation15 + $0x638] ss:$148 sps:$4 sm:$0xff]  }
 0x391   : > { %2981 = vmatpush1.bf16.msra.mxu0 %v4300_v37  ;;  %v4411_v37 = vld [vmem:[#allocation15 + $0x1a0] ss:$148 sps:$4 sm:$0xff]  }
 0x392   : > { %2982 = vmatprep.subr.bf16.mxu0 %v4308_v39  ;;  %v5001_v39 = vld [vmem:[#allocation16] sm:$0xff] }
 0x393   : > { %3022 = vmatpush1.bf16.msra.mxu1 %v4339_v50 }
 0x394   : > { %3023 = vmatprep.subr.bf16.mxu1 %v4347_v51 }
 0x395   : > { %2983 = vmatpush1.bf16.msra.mxu0 %v4306_v41  ;;  %v4419_v41 = vld [vmem:[#allocation15 + $0x2cc] ss:$148 sps:$4 sm:$0xff]  }
 0x396   : > { %2984 = vmatprep.subr.bf16.mxu0 %v4311_v44  ;;  %v890_v44 = vrot.slane %v5001_v39, %v4998_v36 }
 0x397   : > { %3024 = vmatpush1.bf16.msra.mxu1 %v4345_v53  ;;  %v4423_v53 = vld [vmem:[#allocation15 + $0x3f0] ss:$148 sps:$4 sm:$0xff]  }
 0x398   : > { %3025 = vmatprep.subr.bf16.mxu1 %v4353_v55 }
 0x399   : > { %2985 = vmatpush1.bf16.msra.mxu0 %v4309_v46  ;;  %v894_v46 = vrot.slane %v5001_v39, %v5004_v40 }
 0x39a   : > { %3052 = vmatprep.subr.bf16.mxu0 %v4320_v48  ;;  %v4425_v48 = vld [vmem:[#allocation15 + $0x3f4] ss:$148 sps:$4 sm:$0xff]  }
 0x39b   : > { %3026 = vmatpush1.bf16.msra.mxu1 %v4351_v57  ;;  %v4431_v57 = vld [vmem:[#allocation15 + $0x51c] ss:$148 sps:$4 sm:$0xff]  }
 0x39c   : > { %3003 = vmatmul.mubr.bf16.vlgmr.msra.gmra.mrb[20].mxu0 %v4966_v11  ;;  %3093 = vmatprep.subr.bf16.mxu1 %v4362_v59  ;;  %v4407_v59 = vld [vmem:[#allocation15 + $0x88c] ss:$148 sps:$4 sm:$0xff]  }
 0x39d   : > { %3053 = vmatpush1.bf16.msra.mxu0 %v4318_v49  ;;  %3084 = vmatprep.mubr.bf16.mxu0 %v4738_v42  ;;  %v4404_v49 = vld [vmem:[#allocation15 + $0x764] ss:$148 sps:$4 sm:$0xff]  }
 0x39e   : > { %3054 = vmatprep.subr.bf16.mxu0 %v4326_v52  ;;  %3044 = vmatmul.mubr.bf16.vlgmr.msra.gmra.mrb[20].mxu1 %v4966_v11 }
 0x39f   : > { %3094 = vmatpush1.bf16.msra.mxu1 %v4360_v61  ;;  %3125 = vmatprep.mubr.bf16.mxu1 %v4738_v42  ;;  %v4429_v61 = vld [vmem:[#allocation15 + $0x518] ss:$148 sps:$4 sm:$0xff]  }
 0x3a0   : > { %3095 = vmatprep.subr.bf16.mxu1 %v4365_v63  ;;  %v4405_v63 = vld [vmem:[#allocation15 + $0x888] ss:$148 sps:$4 sm:$0xff]  }
 0x3a1   : > { %3055 = vmatpush1.bf16.msra.mxu0 %v4324_v54 }
 0x3a2   : > { %3056 = vmatprep.subr.bf16.mxu0 %v4332_v56  ;;  %v4402_v56 = vld [vmem:[#allocation15 + $0x760] ss:$148 sps:$4 sm:$0xff]  }
 0x3a3   : > { %3096 = vmatpush1.bf16.msra.mxu1 %v4363_v1  ;;  %v4416_v1 = vld [vmem:[#allocation15 + $0x84] ss:$148 sps:$4 sm:$0xff]  }
 0x3a4   : > { %3097 = vmatprep.subr.bf16.mxu1 %v4371_v3  ;;  %v4435_v3 = vld [vmem:[#allocation15 + $0x640] ss:$148 sps:$4 sm:$0xff]  }
 0x3a5   : > { %3057 = vmatpush1.bf16.msra.mxu0 %v4330_v58 }
 0x3a6   : > { %3058 = vmatprep.subr.bf16.mxu0 %v4338_v60  ;;  %v5011_v60 = vsub.s32 2, %v4994_v31 }
 0x3a7   : > { %3098 = vmatpush1.bf16.msra.mxu1 %v4369_v5  ;;  %v4414_v5 = vld [vmem:[#allocation15 + $0x80] ss:$148 sps:$4 sm:$0xff]  }
 0x3a8   : > { %3099 = vmatprep.subr.bf16.mxu1 %v4377_v7  ;;  %v4422_v7 = vld [vmem:[#allocation15 + $0x1ac] ss:$148 sps:$4 sm:$0xff]  }
 0x3a9   : > { %3059 = vmatpush1.bf16.msra.mxu0 %v4336_v62  ;;  %v5014_v62 = vsub.s32 3, %v4994_v31 }
 0x3aa   : > { %3060 = vmatprep.subr.bf16.mxu0 %v4344_v0  ;;  %v4437_v0 = vld [vmem:[#allocation15 + $0x644] ss:$148 sps:$4 sm:$0xff]  }
 0x3ab   : > { %3100 = vmatpush1.bf16.msra.mxu1 %v4375_v9 }
 0x3ac   : > { %3101 = vmatprep.subr.bf16.mxu1 %v4383_v12 }
 0x3ad   : > { %3061 = vmatpush1.bf16.msra.mxu0 %v4342_v2  ;;  %v898_v2 = vrot.slane %v5001_v39, %v5011_v60 }
 0x3ae   : > { %3062 = vmatprep.subr.bf16.mxu0 %v4350_v4  ;;  %v902_v4 = vrot.slane %v5001_v39, %v5014_v62 }
 0x3af   : > { %3102 = vmatpush1.bf16.msra.mxu1 %v4381_v14  ;;  %v4441_v14 = vld [vmem:[#allocation15 + $0x768] ss:$148 sps:$4 sm:$0xff]  }
 0x3b0   : > { %3103 = vmatprep.subr.bf16.mxu1 %v4389_v16 }
 0x3b1   : > { %3063 = vmatpush1.bf16.msra.mxu0 %v4348_v6  ;;  %v4443_v6 = vld [vmem:[#allocation15 + $0x76c] ss:$148 sps:$4 sm:$0xff]  }
 0x3b2   : > { %3064 = vmatprep.subr.bf16.mxu0 %v4356_v8 }
 0x3b3   : > { %3104 = vmatpush1.bf16.msra.mxu1 %v4387_v18  ;;  %v4428_v18 = vld [vmem:[#allocation15 + $0x2d4] ss:$148 sps:$4 sm:$0xff]  }
 0x3b4   : > { %3105 = vmatprep.subr.bf16.mxu1 %v4395_v20  ;;  %v4426_v20 = vld [vmem:[#allocation15 + $0x2d0] ss:$148 sps:$4 sm:$0xff]  }
 0x3b5   : > { %3065 = vmatpush1.bf16.msra.mxu0 %v4354_v10 }
 0x3b6   : > { %3066 = vmatprep.subr.bf16.mxu0 %v4359_v13 }
 0x3b7   : > { %3106 = vmatpush1.bf16.msra.mxu1 %v4393_v22  ;;  %v4434_v22 = vld [vmem:[#allocation15 + $0x3fc] ss:$148 sps:$4 sm:$0xff]  }
 0x3b8   : > { %3107 = vmatprep.subr.bf16.mxu1 %v4401_v24  ;;  %v4432_v24 = vld [vmem:[#allocation15 + $0x3f8] ss:$148 sps:$4 sm:$0xff]  }
 0x3b9   : > { %3067 = vmatpush1.bf16.msra.mxu0 %v4357_v15  ;;  %v4420_v15 = vld [vmem:[#allocation15 + $0x1a8] ss:$148 sps:$4 sm:$0xff]  }
 0x3ba   : > { %3134 = vmatprep.subr.bf16.mxu0 %v4368_v17  ;;  %v4449_v17 = vld [vmem:[#allocation15 + $0x894] ss:$148 sps:$4 sm:$0xff]  }
 0x3bb   : > { %3108 = vmatpush1.bf16.msra.mxu1 %v4399_v27  ;;  %v5024_v27 = vsub.s32 4, %v4994_v31 }
 0x3bc   : > { %3085 = vmatmul.mubr.bf16.vlgmr.msra.gmra.mrb[24].mxu0 %v4966_v11  ;;  %3175 = vmatprep.subr.bf16.mxu1 %v4410_v29  ;;  %v4438_v29 = vld [vmem:[#allocation15 + $0x520] ss:$148 sps:$4 sm:$0xff]  }
 0x3bd   : > { %3135 = vmatpush1.bf16.msra.mxu0 %v4366_v19  ;;  %3166 = vmatprep.mubr.bf16.mxu0 %v4738_v42  ;;  %v4447_v19 = vld [vmem:[#allocation15 + $0x890] ss:$148 sps:$4 sm:$0xff]  }
 0x3be   : > { %3136 = vmatprep.subr.bf16.mxu0 %v4374_v21  ;;  %3126 = vmatmul.mubr.bf16.vlgmr.msra.gmra.mrb[24].mxu1 %v4966_v11  ;;  %v4458_v21 = vld [vmem:[#allocation15 + $0x8c] ss:$148 sps:$4 sm:$0xff]  }
 0x3bf   : > { %3176 = vmatpush1.bf16.msra.mxu1 %v4408_v32  ;;  %3207 = vmatprep.mubr.bf16.mxu1 %v4738_v42  ;;  %v4465_v32 = vld [vmem:[#allocation15 + $0x2dc] ss:$148 sps:$4 sm:$0xff]  }
 0x3c0   : > { %3177 = vmatprep.subr.bf16.mxu1 %v4413_v34  ;;  %v906_v34 = vrot.slane %v5001_v39, %v5024_v27 }
 0x3c1   : > { %3137 = vmatpush1.bf16.msra.mxu0 %v4372_v23  ;;  %v4456_v23 = vld [vmem:[#allocation15 + $0x88] ss:$148 sps:$4 sm:$0xff]  }
 0x3c2   : > { %3138 = vmatprep.subr.bf16.mxu0 %v4380_v25  ;;  %v4461_v25 = vld [vmem:[#allocation15 + $0x1b4] ss:$148 sps:$4 sm:$0xff]  }
 0x3c3   : > { %3178 = vmatpush1.bf16.msra.mxu1 %v4411_v37 }
 0x3c4   : > { %3179 = vmatprep.subr.bf16.mxu1 %v4419_v41  ;;  %v4452_v41 = vld [vmem:[#allocation15 + $0x774] ss:$148 sps:$4 sm:$0xff]  }
 0x3c5   : > { %3139 = vmatpush1.bf16.msra.mxu0 %v4378_v28  ;;  %v4459_v28 = vld [vmem:[#allocation15 + $0x1b0] ss:$148 sps:$4 sm:$0xff]  }
 0x3c6   : > { %3140 = vmatprep.subr.bf16.mxu0 %v4386_v30  ;;  %v5028_v30 = vsub.s32 5, %v4994_v31 }
 0x3c7   : > { %3180 = vmatpush1.bf16.msra.mxu1 %v4417_v45 }
 0x3c8   : > { %3181 = vmatprep.subr.bf16.mxu1 %v4425_v48  ;;  %v910_v37 = vrot.slane %v5001_v39, %v5028_v30 }
 0x3c9   : > { %3141 = vmatpush1.bf16.msra.mxu0 %v4384_v33  ;;  %v4446_v33 = vld [vmem:[#allocation15 + $0x64c] ss:$148 sps:$4 sm:$0xff]  }
 0x3ca   : > { %3142 = vmatprep.subr.bf16.mxu0 %v4392_v35  ;;  %v4463_v35 = vld [vmem:[#allocation15 + $0x2d8] ss:$148 sps:$4 sm:$0xff]  }
 0x3cb   : > { %3182 = vmatpush1.bf16.msra.mxu1 %v4423_v53  ;;  %v5035_v53 = vsub.s32 6, %v4994_v31 }
 0x3cc   : > { %3183 = vmatprep.subr.bf16.mxu1 %v4431_v57  ;;  %v4477_v57 = vld [vmem:[#allocation15 + $0x654] ss:$148 sps:$4 sm:$0xff]  }
 0x3cd   : > { %3143 = vmatpush1.bf16.msra.mxu0 %v4390_v38  ;;  %v4444_v38 = vld [vmem:[#allocation15 + $0x648] ss:$148 sps:$4 sm:$0xff]  }
 0x3ce   : > { %3144 = vmatprep.subr.bf16.mxu0 %v4398_v43 }
 0x3cf   : > { %v2594_v50 = vpop.f32.mrb[0].mxu0  ;;  %3184 = vmatpush1.bf16.msra.mxu1 %v4429_v61 }
 0x3d0   : > { %v2595_v51 = vadd.f32 %v2594_v50, %v890_v44  ;;  %v2596_v52 = vpop.f32.mrb[1].mxu0  ;;  %3185 = vmatprep.subr.bf16.mxu1 %v4437_v0  ;;  %v4473_v50 = vld [vmem:[#allocation15 + $0x52c] ss:$148 sps:$4 sm:$0xff]   ;;  %v4481_v0 = vld [vmem:[#allocation15 + $0x77c] ss:$148 sps:$4 sm:$0xff]  }
 0x3d1   : > { %v2597_v54 = vadd.f32 %v2596_v52, %v894_v46  ;;  %v2598_v55 = vpop.f32.mrb[2].mxu0  ;;  %3145 = vmatpush1.bf16.msra.mxu0 %v4396_v47  ;;  %v2635_v8 = vpop.f32.mrb[0].mxu1  ;;  %v4467_v46 = vld [vmem:[#allocation15 + $0x400] ss:$148 sps:$4 sm:$0xff]   ;;  %v4455_v52 = vld [vmem:[#allocation15 + $0x89c] ss:$148 sps:$4 sm:$0xff]  }
 0x3d2   : > { %3338 = vst [vmem:[#allocation18] sm:$0xff] %v2595_v51  ;;  %v2599_v58 = vpop.f32.mrb[3].mxu0  ;;  %3146 = vmatprep.subr.bf16.mxu0 %v4404_v49  ;;  %v2636_v9 = vadd.f32 %v2635_v8, %v898_v2  ;;  %v2637_v10 = vpop.f32.mrb[1].mxu1  ;;  %v4450_v49 = vld [vmem:[#allocation15 + $0x770] ss:$148 sps:$4 sm:$0xff]   ;;  %v5038_v55 = vsub.s32 7, %v4994_v31 }
 0x3d3   : > { %3339 = vst [vmem:[#allocation18 + $0x8] sm:$0xff] %v2597_v54  ;;  %v2638_v12 = vadd.f32 %v2637_v10, %v902_v4  ;;  %3186 = vmatpush1.bf16.msra.mxu1 %v4435_v3  ;;  %v2639_v13 = vpop.f32.mrb[2].mxu1  ;;  %v4471_v54 = vld [vmem:[#allocation15 + $0x528] ss:$148 sps:$4 sm:$0xff]   ;;  %v914_v58 = vrot.slane %v5001_v39, %v5035_v53  ;;  %v4470_v10 = vld [vmem:[#allocation15 + $0x2e0] ss:$148 sps:$4 sm:$0xff]  }
 0x3d4   : > { %3340 = vst [vmem:[#allocation18 + $0x10] sm:$0xff] %v2636_v9  ;;  %v2640_v16 = vpop.f32.mrb[3].mxu1  ;;  %3187 = vmatprep.subr.bf16.mxu1 %v4443_v6  ;;  %v918_v61 = vrot.slane %v5001_v39, %v5038_v55  ;;  %v4479_v6 = vld [vmem:[#allocation15 + $0x778] ss:$148 sps:$4 sm:$0xff]   ;;  %v4483_v9 = vld [vmem:[#allocation15 + $0x8a0] ss:$148 sps:$4 sm:$0xff]  }
 0x3d5   : > { %3147 = vmatpush1.bf16.msra.mxu0 %v4402_v56  ;;  %3341 = vst [vmem:[#allocation18 + $0x18] sm:$0xff] %v2638_v12  ;;  %v4453_v56 = vld [vmem:[#allocation15 + $0x898] ss:$148 sps:$4 sm:$0xff]   ;;  %v4474_v12 = vld [vmem:[#allocation15 + $0x408] ss:$148 sps:$4 sm:$0xff]  }
 0x3d6   : > { %3148 = vmatprep.subr.bf16.mxu0 %v4407_v59  ;;  %v4475_v59 = vld [vmem:[#allocation15 + $0x650] ss:$148 sps:$4 sm:$0xff]  }
 0x3d7   : > { %3188 = vmatpush1.bf16.msra.mxu1 %v4441_v14  ;;  %v4485_v39 = vld [vmem:[#allocation15 + $0x8a4] ss:$148 sps:$4 sm:$0xff]   ;;  %v878_v14 = vld [vmem:[#allocation16 + $0x8] sm:$0xff] }
 0x3d8   : > { %3189 = vmatprep.subr.bf16.mxu1 %v4449_v17  ;;  %v4478_v13 = vld [vmem:[#allocation15 + $0x530] ss:$148 sps:$4 sm:$0xff]   ;;  %v926_v16 = vrot.slane %v878_v14, %v5004_v40  ;;  %v4482_v17 = vld [vmem:[#allocation15 + $0x658] ss:$148 sps:$4 sm:$0xff]  }
 0x3d9   : > { %3149 = vmatpush1.bf16.msra.mxu0 %v4405_v63  ;;  %v4462_v63 = vld [vmem:[#allocation15 + $0x90] ss:$148 sps:$4 sm:$0xff]  }
 0x3da   : > { %3216 = vmatprep.subr.bf16.mxu0 %v4416_v1  ;;  %v4739_v1 = vmov 0.0  }
 0x3db   : > { %3190 = vmatpush1.bf16.msra.mxu1 %v4447_v19 }
 0x3dc   : > { %3167 = vmatmul.mubr.bf16.vlgmr.msra.gmra.mrb[28].mxu0 %v4966_v11  ;;  %3257 = vmatprep.subr.bf16.mxu1 %v4458_v21 }
 0x3dd   : > { %3217 = vmatpush1.bf16.msra.mxu0 %v4414_v5  ;;  %3248 = vmatprep.mubr.bf16.mxu0 %v4738_v42 }
 0x3de   : > { %3218 = vmatprep.subr.bf16.mxu0 %v4422_v7  ;;  %3208 = vmatmul.mubr.bf16.vlgmr.msra.gmra.mrb[28].mxu1 %v4966_v11  ;;  %v4466_v7 = vld [vmem:[#allocation15 + $0x1b8] ss:$148 sps:$4 sm:$0xff]  }
 0x3df   : > { %3258 = vmatpush1.bf16.msra.mxu1 %v4456_v23  ;;  %3289 = vmatprep.mubr.bf16.mxu1 %v4738_v42  ;;  %v4469_v42 = vld [vmem:[#allocation15 + $0x404] ss:$148 sps:$4 sm:$0xff]   ;;  %v4486_v23 = vld [vmem:[#allocation15 + $0x780] ss:$148 sps:$4 sm:$0xff]  }
 0x3e0   : > { %3259 = vmatprep.subr.bf16.mxu1 %v4461_v25  ;;  %v4487_v25 = vld [vmem:[#allocation15 + $0x8a8] ss:$148 sps:$4 sm:$0xff]  }
 0x3e1   : > { %3219 = vmatpush1.bf16.msra.mxu0 %v4420_v15  ;;  %v922_v15 = vrot.slane %v878_v14, %v4998_v36 }
 0x3e2   : > { %3220 = vmatprep.subr.bf16.mxu0 %v4428_v18 }
 0x3e3   : > { %3260 = vmatpush1.bf16.msra.mxu1 %v4459_v28  ;;  %v934_v28 = vrot.slane %v878_v14, %v5014_v62 }
 0x3e4   : > { %3261 = vmatprep.subr.bf16.mxu1 %v4465_v32 }
 0x3e5   : > { %3221 = vmatpush1.bf16.msra.mxu0 %v4426_v20 }
 0x3e6   : > { %3222 = vmatprep.subr.bf16.mxu0 %v4434_v22 }
 0x3e7   : > { %3262 = vmatpush1.bf16.msra.mxu1 %v4463_v35 }
 0x3e8   : > { %3263 = vmatprep.subr.bf16.mxu1 %v4469_v42  ;;  %v942_v42 = vrot.slane %v878_v14, %v5028_v30 }
 0x3e9   : > { %3223 = vmatpush1.bf16.msra.mxu0 %v4432_v24 }
 0x3ea   : > { %3224 = vmatprep.subr.bf16.mxu0 %v4440_v26  ;;  %v930_v26 = vrot.slane %v878_v14, %v5011_v60 }
 0x3eb   : > { %3264 = vmatpush1.bf16.msra.mxu1 %v4467_v46 }
 0x3ec   : > { %3265 = vmatprep.subr.bf16.mxu1 %v4473_v50 }
 0x3ed   : > { %3225 = vmatpush1.bf16.msra.mxu0 %v4438_v29 }
 0x3ee   : > { %3226 = vmatprep.subr.bf16.mxu0 %v4446_v33 }
 0x3ef   : > { %v2676_v43 = vpop.f32.mrb[4].mxu0  ;;  %3266 = vmatpush1.bf16.msra.mxu1 %v4471_v54 }
 0x3f0   : > { %v2677_v44 = vadd.f32 %v2676_v43, %v906_v34  ;;  %v2678_v45 = vpop.f32.mrb[5].mxu0  ;;  %3267 = vmatprep.subr.bf16.mxu1 %v4477_v57  ;;  %v879_v57 = vld [vmem:[#allocation16 + $0x10] sm:$0xff] }
 0x3f1   : > { %v2679_v47 = vadd.f32 %v2678_v45, %v910_v37  ;;  %v2680_v48 = vpop.f32.mrb[6].mxu0  ;;  %3227 = vmatpush1.bf16.msra.mxu0 %v4444_v38  ;;  %v2717_v31 = vpop.f32.mrb[4].mxu1  ;;  %v938_v38 = vrot.slane %v878_v14, %v5024_v27 }
 0x3f2   : > { %3342 = vst [vmem:[#allocation18 + $0x20] sm:$0xff] %v2677_v44  ;;  %v2681_v51 = vpop.f32.mrb[7].mxu0  ;;  %3228 = vmatprep.subr.bf16.mxu0 %v4452_v41  ;;  %v2718_v2 = vadd.f32 %v2717_v31, %v914_v58  ;;  %v2719_v3 = vpop.f32.mrb[5].mxu1  ;;  %v946_v48 = vrot.slane %v878_v14, %v5035_v53  ;;  %v954_v58 = vrot.slane %v879_v57, %v4998_v36 }
 0x3f3   : > { %3343 = vst [vmem:[#allocation18 + $0x28] sm:$0xff] %v2679_v47  ;;  %v2720_v4 = vadd.f32 %v2719_v3, %v918_v61  ;;  %3268 = vmatpush1.bf16.msra.mxu1 %v4475_v59  ;;  %v2721_v5 = vpop.f32.mrb[6].mxu1  ;;  %v958_v59 = vrot.slane %v879_v57, %v5004_v40  ;;  %v962_v3 = vrot.slane %v879_v57, %v5011_v60 }
 0x3f4   : > { %3344 = vst [vmem:[#allocation18 + $0x30] sm:$0xff] %v2718_v2  ;;  %v2722_v8 = vpop.f32.mrb[7].mxu1  ;;  %3269 = vmatprep.subr.bf16.mxu1 %v4481_v0 }
 0x3f5   : > { %3229 = vmatpush1.bf16.msra.mxu0 %v4450_v49  ;;  %3345 = vst [vmem:[#allocation18 + $0x38] sm:$0xff] %v2720_v4  ;;  %v966_v4 = vrot.slane %v879_v57, %v5014_v62 }
 0x3f6   : > { %3230 = vmatprep.subr.bf16.mxu0 %v4455_v52 }
 0x3f7   : > { %3270 = vmatpush1.bf16.msra.mxu1 %v4479_v6 }
 0x3f8   : > { %3271 = vmatprep.subr.bf16.mxu1 %v4485_v39 }
 0x3f9   : > { %3231 = vmatpush1.bf16.msra.mxu0 %v4453_v56 }
 0x3fa   : > { %3886 = vmatprep.subr.bf16.mxu0 %v4739_v1 }
 0x3fb   : > { %3272 = vmatpush1.bf16.msra.mxu1 %v4483_v9 }
 0x3fc   : > { %3249 = vmatmul.mubr.bf16.vlgmr.msra.gmra.mrb[32].mxu0 %v4966_v11 }
 0x3fd   : > { %3887 = vmatpush3.bf16.msra.mxu0 %v4462_v63  ;;  %3902 = vmatprep.mubr.msk.bf16.mxu0 %vm4740_vm2, %v4739_v1 }
 0x3fe   : > { %3888 = vmatprep.subr.bf16.mxu0 %v4739_v1  ;;  %3290 = vmatmul.mubr.bf16.vlgmr.msra.gmra.mrb[32].mxu1 %v4966_v11 }
 0x401   : > { %3889 = vmatpush3.bf16.msra.mxu0 %v4466_v7 }
 0x402   : > { %3890 = vmatprep.subr.bf16.mxu0 %v4739_v1 }
 0x405   : > { %3891 = vmatpush3.bf16.msra.mxu0 %v4470_v10  ;;  %v970_v10 = vrot.slane %v879_v57, %v5024_v27 }
 0x406   : > { %3892 = vmatprep.subr.bf16.mxu0 %v4739_v1 }
 0x409   : > { %3893 = vmatpush3.bf16.msra.mxu0 %v4474_v12  ;;  %v974_v12 = vrot.slane %v879_v57, %v5028_v30 }
 0x40a   : > { %3894 = vmatprep.subr.bf16.mxu0 %v4739_v1 }
 0x40d   : > { %3895 = vmatpush3.bf16.msra.mxu0 %v4478_v13 }
 0x40e   : > { %3896 = vmatprep.subr.bf16.mxu0 %v4739_v1 }
 0x40f   : > { %v2758_v18 = vpop.f32.mrb[8].mxu0 }
 0x410   : > { %v2759_v19 = vadd.f32 %v2758_v18, %v922_v15  ;;  %v2760_v20 = vpop.f32.mrb[9].mxu0 }
 0x411   : > { %v2761_v21 = vadd.f32 %v2760_v20, %v926_v16  ;;  %v2762_v22 = vpop.f32.mrb[10].mxu0  ;;  %3897 = vmatpush3.bf16.msra.mxu0 %v4482_v17  ;;  %v2799_v29 = vpop.f32.mrb[8].mxu1  ;;  %v982_v20 = vrot.slane %v879_v57, %v5038_v55 }
 0x412   : > { %3346 = vst [vmem:[#allocation18 + $0x40] sm:$0xff] %v2759_v19  ;;  %v2763_v24 = vpop.f32.mrb[11].mxu0  ;;  %3898 = vmatprep.subr.bf16.mxu0 %v4739_v1  ;;  %v2800_v32 = vadd.f32 %v2799_v29, %v930_v26  ;;  %v2801_v33 = vpop.f32.mrb[9].mxu1  ;;  %v978_v19 = vrot.slane %v879_v57, %v5035_v53 }
 0x413   : > { %3347 = vst [vmem:[#allocation18 + $0x48] sm:$0xff] %v2761_v21  ;;  %v2802_v34 = vadd.f32 %v2801_v33, %v934_v28  ;;  %v2803_v35 = vpop.f32.mrb[10].mxu1  ;;  %v880_v28 = vld [vmem:[#allocation16 + $0x18] sm:$0xff] }
 0x414   : > { %3348 = vst [vmem:[#allocation18 + $0x50] sm:$0xff] %v2800_v32  ;;  %v2804_v37 = vpop.f32.mrb[11].mxu1  ;;  %v986_v29 = vrot.slane %v880_v28, %v4998_v36  ;;  %v990_v32 = vrot.slane %v880_v28, %v5004_v40 }
 0x415   : > { %3899 = vmatpush3.bf16.msra.mxu0 %v4486_v23  ;;  %3349 = vst [vmem:[#allocation18 + $0x58] sm:$0xff] %v2802_v34 }
 0x416   : > { %3900 = vmatprep.subr.bf16.mxu0 %v4739_v1 }
 0x419   : > { %3901 = vmatpush3.bf16.msra.mxu0 %v4487_v25 }
 0x41c   : > { %3903 = vmatmul.mubr.bf16.vlgmr.msra.gmra.mrb[36].mxu0 %v4966_v11  ;;  %v950_v11 = vrot.slane %v878_v14, %v5038_v55 }
 0x42f   : > { %v2840_v41 = vpop.f32.mrb[12].mxu0 }
 0x430   : > { %v2841_v43 = vadd.f32 %v2840_v41, %v938_v38  ;;  %v2842_v44 = vpop.f32.mrb[13].mxu0  ;;  %v994_v41 = vrot.slane %v880_v28, %v5011_v60 }
 0x431   : > { %v2843_v45 = vadd.f32 %v2842_v44, %v942_v42  ;;  %v2844_v46 = vpop.f32.mrb[14].mxu0  ;;  %v2881_v49 = vpop.f32.mrb[12].mxu1 }
 0x432   : > { %3350 = vst [vmem:[#allocation18 + $0x60] sm:$0xff] %v2841_v43  ;;  %v2845_v47 = vpop.f32.mrb[15].mxu0  ;;  %v2882_v50 = vadd.f32 %v2881_v49, %v946_v48  ;;  %v2883_v51 = vpop.f32.mrb[13].mxu1  ;;  %v998_v43 = vrot.slane %v880_v28, %v5014_v62  ;;  %v1002_v49 = vrot.slane %v880_v28, %v5024_v27 }
 0x433   : > { %3351 = vst [vmem:[#allocation18 + $0x68] sm:$0xff] %v2843_v45  ;;  %v2884_v52 = vadd.f32 %v2883_v51, %v950_v11  ;;  %v2885_v54 = vpop.f32.mrb[14].mxu1 }
 0x434   : > { %3352 = vst [vmem:[#allocation18 + $0x70] sm:$0xff] %v2882_v50  ;;  %v2886_v56 = vpop.f32.mrb[15].mxu1  ;;  %v1006_v50 = vrot.slane %v880_v28, %v5028_v30  ;;  %v881_v30 = vld [vmem:[#allocation16 + $0x20] sm:$0x1f] }
 0x435   : > { %3353 = vst [vmem:[#allocation18 + $0x78] sm:$0xff] %v2884_v52 }
 0x44f   : > { %v2922_v61 = vpop.f32.mrb[16].mxu0 }
 0x450   : > { %v2923_v63 = vadd.f32 %v2922_v61, %v954_v58  ;;  %v2924_v0 = vpop.f32.mrb[17].mxu0  ;;  %v1014_v61 = vrot.slane %v880_v28, %v5038_v55 }
 0x451   : > { %v2925_v1 = vadd.f32 %v2924_v0, %v958_v59  ;;  %v2926_v31 = vpop.f32.mrb[18].mxu0  ;;  %v2963_v5 = vpop.f32.mrb[16].mxu1  ;;  %v1010_v59 = vrot.slane %v880_v28, %v5035_v53 }
 0x452   : > { %3354 = vst [vmem:[#allocation18 + $0x80] sm:$0xff] %v2923_v63  ;;  %v2927_v2 = vpop.f32.mrb[19].mxu0  ;;  %v2964_v6 = vadd.f32 %v2963_v5, %v962_v3  ;;  %v2965_v7 = vpop.f32.mrb[17].mxu1  ;;  %v1022_v5 = vrot.slane %v881_v30, %v5004_v40  ;;  %v1034_v40 = vrot.slane %v881_v30, %v5024_v27 }
 0x453   : > { %3355 = vst [vmem:[#allocation18 + $0x88] sm:$0xff] %v2925_v1  ;;  %v2966_v8 = vadd.f32 %v2965_v7, %v966_v4  ;;  %v2967_v39 = vpop.f32.mrb[18].mxu1  ;;  %v1018_v4 = vrot.slane %v881_v30, %v4998_v36 }
 0x454   : > { %3356 = vst [vmem:[#allocation18 + $0x90] sm:$0xff] %v2964_v6  ;;  %v2968_v9 = vpop.f32.mrb[19].mxu1 }
 0x455   : > { %3357 = vst [vmem:[#allocation18 + $0x98] sm:$0xff] %v2966_v8  ;;  %v1026_v9 = vrot.slane %v881_v30, %v5011_v60 }
 0x46f   : > { %v3004_v13 = vpop.f32.mrb[20].mxu0 }
 0x470   : > { %v3005_v14 = vadd.f32 %v3004_v13, %v970_v10  ;;  %v3006_v15 = vpop.f32.mrb[21].mxu0  ;;  %v1030_v10 = vrot.slane %v881_v30, %v5014_v62 }
 0x471   : > { %v3007_v16 = vadd.f32 %v3006_v15, %v974_v12  ;;  %v3008_v17 = vpop.f32.mrb[22].mxu0  ;;  %v3045_v21 = vpop.f32.mrb[20].mxu1 }
 0x472   : > { %3358 = vst [vmem:[#allocation18 + $0xa0] sm:$0xff] %v3005_v14  ;;  %v3009_v18 = vpop.f32.mrb[23].mxu0  ;;  %v3046_v22 = vadd.f32 %v3045_v21, %v978_v19  ;;  %v3047_v23 = vpop.f32.mrb[21].mxu1 }
 0x473   : > { %3359 = vst [vmem:[#allocation18 + $0xa8] sm:$0xff] %v3007_v16  ;;  %v3048_v24 = vadd.f32 %v3047_v23, %v982_v20  ;;  %v3049_v25 = vpop.f32.mrb[22].mxu1 }
 0x474   : > { %3360 = vst [vmem:[#allocation18 + $0xb0] sm:$0xff] %v3046_v22  ;;  %v3050_v26 = vpop.f32.mrb[23].mxu1 }
 0x475   : > { %3361 = vst [vmem:[#allocation18 + $0xb8] sm:$0xff] %v3048_v24 }
 0x48f   : > { %v3086_v33 = vpop.f32.mrb[24].mxu0 }
 0x490   : > { %v3087_v34 = vadd.f32 %v3086_v33, %v986_v29  ;;  %v3088_v35 = vpop.f32.mrb[25].mxu0 }
 0x491   : > { %v3089_v37 = vadd.f32 %v3088_v35, %v990_v32  ;;  %v3090_v38 = vpop.f32.mrb[26].mxu0  ;;  %v3127_v44 = vpop.f32.mrb[24].mxu1 }
 0x492   : > { %3362 = vst [vmem:[#allocation18 + $0xc0] sm:$0xff] %v3087_v34  ;;  %v3091_v42 = vpop.f32.mrb[27].mxu0  ;;  %v3128_v45 = vadd.f32 %v3127_v44, %v994_v41  ;;  %v3129_v46 = vpop.f32.mrb[25].mxu1 }
 0x493   : > { %3363 = vst [vmem:[#allocation18 + $0xc8] sm:$0xff] %v3089_v37  ;;  %v3130_v47 = vadd.f32 %v3129_v46, %v998_v43  ;;  %v3131_v48 = vpop.f32.mrb[26].mxu1 }
 0x494   : > { %3364 = vst [vmem:[#allocation18 + $0xd0] sm:$0xff] %v3128_v45  ;;  %v3132_v11 = vpop.f32.mrb[27].mxu1 }
 0x495   : > { %3365 = vst [vmem:[#allocation18 + $0xd8] sm:$0xff] %v3130_v47 }
 0x4af   : > { %v3168_v51 = vpop.f32.mrb[28].mxu0 }
 0x4b0   : > { %v3169_v52 = vadd.f32 %v3168_v51, %v1002_v49  ;;  %v3170_v54 = vpop.f32.mrb[29].mxu0 }
 0x4b1   : > { %v3171_v56 = vadd.f32 %v3170_v54, %v1006_v50  ;;  %v3172_v57 = vpop.f32.mrb[30].mxu0  ;;  %v3209_v63 = vpop.f32.mrb[28].mxu1 }
 0x4b2   : > { %3366 = vst [vmem:[#allocation18 + $0xe0] sm:$0xff] %v3169_v52  ;;  %v3173_v58 = vpop.f32.mrb[31].mxu0  ;;  %v3210_v0 = vadd.f32 %v3209_v63, %v1010_v59  ;;  %v3211_v1 = vpop.f32.mrb[29].mxu1 }
 0x4b3   : > { %3367 = vst [vmem:[#allocation18 + $0xe8] sm:$0xff] %v3171_v56  ;;  %v3212_v31 = vadd.f32 %v3211_v1, %v1014_v61  ;;  %v3213_v2 = vpop.f32.mrb[30].mxu1 }
 0x4b4   : > { %3368 = vst [vmem:[#allocation18 + $0xf0] sm:$0xff] %v3210_v0  ;;  %v3214_v3 = vpop.f32.mrb[31].mxu1 }
 0x4b5   : > { %3369 = vst [vmem:[#allocation18 + $0xf8] sm:$0xff] %v3212_v31 }
 0x4cf   : > { %v3250_v6 = vpop.f32.mrb[32].mxu0 }
 0x4d0   : > { %v3251_v7 = vadd.f32 %v3250_v6, %v1018_v4  ;;  %v3252_v8 = vpop.f32.mrb[33].mxu0 }
 0x4d1   : > { %v3253_v39 = vadd.f32 %v3252_v8, %v1022_v5  ;;  %v3254_v53 = vpop.f32.mrb[34].mxu0  ;;  %v3291_v12 = vpop.f32.mrb[32].mxu1 }
 0x4d2   : > { %3370 = vst [vmem:[#allocation18 + $0x100] sm:$0xff] %v3251_v7  ;;  %v3255_v55 = vpop.f32.mrb[35].mxu0  ;;  %v3292_v13 = vadd.f32 %v3291_v12, %v1026_v9  ;;  %v3293_v14 = vpop.f32.mrb[33].mxu1 }
 0x4d3   : > { %3371 = vst [vmem:[#allocation18 + $0x108] sm:$0xff] %v3253_v39  ;;  %v3294_v15 = vadd.f32 %v3293_v14, %v1030_v10  ;;  %v3295_v16 = vpop.f32.mrb[34].mxu1 }
 0x4d4   : > { %3372 = vst [vmem:[#allocation18 + $0x110] sm:$0xff] %v3292_v13  ;;  %v3296_v36 = vpop.f32.mrb[35].mxu1 }
 0x4d5   : > { %3373 = vst [vmem:[#allocation18 + $0x118] sm:$0xff] %v3294_v15 }
 0x4ef   : > { %v3332_v17 = vpop.f32.mrb[36].mxu0 }
 0x4f0   : > { %v3333_v18 = vadd.f32 %v3332_v17, %v1034_v40  ;;  %v3904_v19 = vpop.f32.mrb[37].mxu0 }
 0x4f1   : > { %v3335_v20 = vpop.f32.mrb[38].mxu0 }
 0x4f2   : > { %3374 = vst [vmem:[#allocation18 + $0x120] sm:$0xff] %v3333_v18  ;;  %v3905_v21 = vpop.f32.mrb[39].mxu0 }
 0x4f3 PF: > { %p5078_p10 = scmp.eq.s32.totalorder %s3521_s24, 1  ;;  %s4741_s28 = smov [#allocation18]  }
 0x4f4   : > { %s3391_s11 = sshll.u32 %s4741_s28, 4  ;;  %s3392_s11 = int_to_ptr.vmem [resolvable:$true] %s3391_s11 }
 0x4f5   : > { %s4656_s16 = scalar_lea.vmem %s3392_s11, 4736  ;;  %s4662_s17 = scalar_lea.vmem %s3392_s11, 9472 }
 0x4f6   : > { %p4657_p11 = scmp.ne.s32.totalorder %s3392_s11, %s4656_s16  ;;  %p4663_p0 = scmp.lt.s32.totalorder %s3392_s11, %s3392_s11 }
 0x4f7   : > { %p4664_p1 = scmp.lt.s32.totalorder %s4662_s17, %s4656_s16 }
 0x4f8   : > { %p4658_p12 = pnand %p4657_p11, %p5078_p10 }
 0x4f9   : > { %p4665_p2 = por %p4664_p1, %p4663_p0 }
 0x4fa   : > { %p4659_p13 = pneg %p4658_p12 }
 0x4fc   : > { %p4666_p5 = pnand %p4665_p2, %p4659_p13 }
 0x4fe   : > { %4669 = shalt.err (!%p4666_p5)
}
 0x4ff   : > { %s4670_s18 = scalar_lea.hbm %s5119_s6, 4736 }
 0x500   : > { %p4671_p6 = scmp.ne.s32.totalorder %s5119_s6, %s4670_s18  ;;  %p4676_p4 = scmp.lt.u32.totalorder %s4670_s18, %s5119_s6 }
 0x502   : > { %p4672_p8 = pnand %p4671_p6, %p5078_p10 }
 0x504   : > { %p4673_p3 = pneg %p4672_p8 }
 0x506   : > { %p4678_p9 = pnand %p4676_p4, %p4673_p3 }
 0x508   : > { %4681 = shalt.err (!%p4678_p9)
}
 0x509   : > { %3963 = dma.vmem_to_hbm [thread:$0]  (%p5078_p10), %s3392_s11, 4736, %s5119_s6, [#allocation9]  }
 0x50a PF: > { %s5133_s19 = sadd.s32 4294967294, %s4724_s23   ;;  %p5134_p11 = scmp.ge.s32.totalorder %s4724_s23, 2 }
 0x50b   : > { %p4005_p7 = scmp.eq.s32.totalorder %s5133_s19, 1 }
 0x50d   : > { %p3987_p12 = pnand %p4005_p7, %p5134_p11 }
 0x50f   : > { %4711 = dma.done.wait (!%p3987_p12), [#allocation9], 4736  }
 0x510   : > { %4713 = vsyncadd (!%p3987_p12), [#allocation9], 4294962560  ;;  %s25_s23 = sadd.s32 1, %s4724_s23   ;;  %s5135_s21 = smov %s4720_s22 }
 0x511   : > { %p22_p13 = scmp.ge.s32.totalorder %s25_s23, 4   ;;  %s5136_s22 = smov %s5138_s26 }
 0x513   :  { %24 = sbr.rel (!%p22_p13) target bundleno = 8 (0x8), region = 127 }
 0x51a   :  { %3409 = vsyncpa [#allocation8], 1 }
 0x51b   :  { %3411 = vsyncpa [#allocation8 + $0x1], 1 }
 0x51c   :  { %3412 = vsyncpa [#allocation11], 1 }
 0x51d   :  { %3413 = vsyncpa [#allocation14], 1 }
 0x51e   :  { %3414 = vsyncpa [#allocation17], 1 }
 0x51f   :  { %3415 = vsyncpa [#allocation9], 1 }
 0x520   :  { %3417 = vsyncpa [#allocation9 + $0x1], 1 }

</bundles_post_ra>
